<compile_context>
chip_gen: v7x
topology: tpu7x:2x2x1
jax: 0.10.0
libtpu: 0.0.40
codegen_flags: <defaults>
</compile_context>

<pallas_src>
import numpy as np
import jax
import jax.numpy as jnp
from jax.experimental import pallas as pl
from jax.experimental.pallas import tpu as pltpu  # noqa: F401  (TPU backend)


# --------------------- one-time weight / structure packing -------------------

def _round_up(x, m):
    return ((x + m - 1) // m) * m


def _pack_first(w, batch, cin_pad, bpad):
    """ConvTranspose2d(k=2, s=1, p=0) on a 1x1 input.  w: (C0, Cout, 2, 2).

    Returns
      s     : (2, batch*2, bpad)      0/1 row placement per vertical tap ky
      m_cat : (cin_pad, 2 * 2*Cout)   horizontal taps + channel mix, taps concat along N
    """
    c0, cout, k, _ = w.shape
    assert k == 2
    wc = 2 * cout
    m_cat = np.zeros((cin_pad, 2 * wc), np.float32)
    s_all = []
    for ky in range(2):
        m = np.zeros((c0, wc), np.float32)
        for kx in range(2):
            m[:, kx * cout:(kx + 1) * cout] = w[:, :, ky, kx]
        m_cat[:c0, ky * wc:(ky + 1) * wc] = m
        s = np.zeros((batch * 2, bpad), np.float32)
        for b in range(batch):
            s[b * 2 + ky, b] = 1.0
        s_all.append(s)
    return np.stack(s_all), m_cat


def _pack_stride2(w, batch, hin, win, cout_pad=None):
    """ConvTranspose2d(k=4, s=2, p=1).  w: (Cin, Cout, 4, 4).

    Output row yo = 2m+p pulls input row m+dy with ky = p-2dy+1 (same for x), so
    4 (p, dy) combos cover all 16 taps with dense, lane-aligned matmuls only.

    Returns
      s     : (4, batch*Hout, batch*Hin)      0/1 row placement per tap
      m_cat : (Win*Cin, 4 * Wout*Cout_pad)    taps concatenated along N
    """
    cin, cout, k, _ = w.shape
    assert k == 4
    if cout_pad is None:
        cout_pad = cout
    hout, wout = 2 * hin, 2 * win
    wc = wout * cout_pad
    combos = [(0, -1), (0, 0), (1, 0), (1, 1)]          # (output row parity p, dy)
    s_all = []
    m_cat = np.zeros((win * cin, 4 * wc), np.float32)
    for t, (p, dy) in enumerate(combos):
        ky = p - 2 * dy + 1
        s = np.zeros((batch * hout, batch * hin), np.float32)
        for b in range(batch):
            for yo in range(hout):
                if yo % 2 != p:
                    continue
                iy = (yo - p) // 2 + dy
                if 0 <= iy < hin:
                    s[b * hout + yo, b * hin + iy] = 1.0
        m = np.zeros((win * cin, wc), np.float32)
        for xo in range(wout):
            q, n = xo % 2, xo // 2
            for dx in ((-1, 0) if q == 0 else (0, 1)):
                ix = n + dx
                if 0 <= ix < win:
                    kx = q - 2 * dx + 1
                    m[ix * cin:(ix + 1) * cin,
                      xo * cout_pad:xo * cout_pad + cout] = w[:, :, ky, kx]
        s_all.append(s)
        m_cat[:, t * wc:(t + 1) * wc] = m
    return np.stack(s_all), m_cat


def _fold_mats(wout, cout):
    """0/1 matrices: (x,c)-column sums -> per-channel sums, and per-channel -> (x,c)."""
    f = np.zeros((wout * cout, cout), np.float32)
    for x in range(wout):
        for c in range(cout):
            f[x * cout + c, c] = 1.0
    return f, np.ascontiguousarray(f.T)


def init_netg_params(key, ndf, ngf, nz, nclasses):
    """Raw parameters in PyTorch layout (ConvTranspose2d weight: (Cin, Cout, k, k))."""
    cin0 = nz + ndf * 2 + nclasses + 1
    ks = jax.random.split(key, 9)

    def conv_w(k, cin, cout, ksz):
        return (0.02 * jax.random.normal(k, (cin, cout, ksz, ksz))).astype(jnp.float32)

    def bn(kg, c):
        g = (1.0 + 0.02 * jax.random.normal(kg, (c,))).astype(jnp.float32)
        return g, jnp.zeros((c,), jnp.float32)

    p = {
        "w1": conv_w(ks[0], cin0, ngf * 8, 2),
        "w2": conv_w(ks[1], ngf * 8, ngf * 4, 4),
        "w3": conv_w(ks[2], ngf * 4, ngf * 2, 4),
        "w4": conv_w(ks[3], ngf * 2, ngf, 4),
        "w5": conv_w(ks[4], ngf, 3, 4),
    }
    p["g1"], p["b1"] = bn(ks[5], ngf * 8)
    p["g2"], p["b2"] = bn(ks[6], ngf * 4)
    p["g3"], p["b3"] = bn(ks[7], ngf * 2)
    p["g4"], p["b4"] = bn(ks[8], ngf)
    return p


def pack_netg_params(raw, batch):
    """One-time layout repack of the PyTorch weights into S / M_cat / fold form."""
    w = {k: np.asarray(v) for k, v in raw.items()}
    c0 = w["w1"].shape[0]
    cin_pad = _round_up(max(c0, 128), 128)          # pad first-layer K dim to lanes
    bpad = _round_up(max(batch, 8), 8)              # pad input rows to sublanes

    packed = {}
    packed["s1"], packed["m1"] = _pack_first(w["w1"], batch, cin_pad, bpad)
    hw_in = {2: 2, 3: 4, 4: 8, 5: 16}
    for i in (2, 3, 4):
        packed[f"s{i}"], packed[f"m{i}"] = _pack_stride2(w[f"w{i}"], batch, hw_in[i], hw_in[i])
    # Last layer: pad Cout 3 -> 4 so the kernel output is 128 lanes wide (dense stores).
    packed["s5"], packed["m5"] = _pack_stride2(w["w5"], batch, 16, 16, cout_pad=4)

    wouts = {1: 2, 2: 4, 3: 8, 4: 16}
    for i in (1, 2, 3, 4):
        c = w[f"g{i}"].shape[0]
        packed[f"g{i}"] = w[f"g{i}"].reshape(1, -1).astype(np.float32)
        packed[f"b{i}"] = w[f"b{i}"].reshape(1, -1).astype(np.float32)
        f, ft = _fold_mats(wouts[i], c)
        packed[f"f{i}"] = f
        packed[f"t{i}"] = ft

    out = {}
    for k, v in packed.items():
        if k[0] in ("s", "m"):          # MXU operands -> bf16 (native MXU path)
            out[k] = jnp.asarray(v, dtype=jnp.bfloat16)
        else:                           # BN parameters / fold matrices stay f32
            out[k] = jnp.asarray(v, dtype=jnp.float32)
    return out


# ------------------------------ fused kernel --------------------------------

def _netg_kernel(x_ref,
                 m1, s1, g1, b1, f1, t1,
                 m2, s2, g2, b2, f2, t2,
                 m3, s3, g3, b3, f3, t3,
                 m4, s4, g4, b4, f4, t4,
                 m5, s5,
                 o_ref):
    def convt(a, m_ref, s_ref):
        # One wide bf16 MXU matmul for all taps, then tiny 0/1 row-placement matmuls
        # on lane-aligned 128-wide column slices.  Accumulate in f32.
        n_taps = s_ref.shape[0]
        wc = m_ref.shape[1] // n_taps
        t = jnp.dot(a.astype(jnp.bfloat16), m_ref[...],
                    preferred_element_type=jnp.float32)
        t = t.astype(jnp.bfloat16)
        out = None
        for i in range(n_taps):
            oi = jnp.dot(s_ref[i], t[:, i * wc:(i + 1) * wc],
                         preferred_element_type=jnp.float32)
            out = oi if out is None else out + oi
        return out                                   # f32 (B*Hout, Wout*Cout)

    def bn_relu(o, g_ref, b_ref, f_ref, ft_ref):
        # o: (B*H, W*C), cols ordered (x, c).  Training-mode BN: single-pass batch
        # stats over (b, y, x), biased variance, eps=1e-5.  The channel fold and the
        # scale/shift re-broadcast use precomputed 0/1 matrices on the MXU instead of
        # lane slices / lane concats.  All stats math in f32.
        cout = g_ref.shape[1]
        wout = o.shape[1] // cout
        n = float(o.shape[0] * wout)
        rsum = jnp.sum(o, axis=0, keepdims=True)                                 # (1, W*C)
        rsq = jnp.sum(o * o, axis=0, keepdims=True)
        csum = jnp.dot(rsum, f_ref[...], preferred_element_type=jnp.float32)     # (1, C)
        csq = jnp.dot(rsq, f_ref[...], preferred_element_type=jnp.float32)
        mean = csum / n
        var = jnp.maximum(csq / n - mean * mean, 0.0)
        inv = jax.lax.rsqrt(var + 1e-5)
        scale = g_ref[...] * inv                                                 # (1, C)
        shift = b_ref[...] - mean * scale
        scale_t = jnp.dot(scale, ft_ref[...], preferred_element_type=jnp.float32)  # (1, W*C)
        shift_t = jnp.dot(shift, ft_ref[...], preferred_element_type=jnp.float32)
        return jnp.maximum(o * scale_t + shift_t, 0.0)

    a = x_ref[...]                                   # (Bpad, 128) f32, rows >= B zeroed
    a = bn_relu(convt(a, m1, s1), g1, b1, f1, t1)    # (B*2,  2*8ngf)   = (4, 128)
    a = bn_relu(convt(a, m2, s2), g2, b2, f2, t2)    # (B*4,  4*4ngf)   = (8, 128)
    a = bn_relu(convt(a, m3, s3), g3, b3, f3, t3)    # (B*8,  8*2ngf)   = (16, 128)
    a = bn_relu(convt(a, m4, s4), g4, b4, f4, t4)    # (B*16, 16*ngf)   = (32, 128)
    o_ref[...] = jnp.tanh(convt(a, m5, s5))          # (B*32, 32*4pad)  = (64, 128)


def _full_spec(shape):
    return pl.BlockSpec(shape, lambda: (0,) * len(shape))


@jax.jit
def netg_forward(packed, x, noise):
    """Mirrors _netG.forward: view -> cat(input, noise, dim=1) -> main(...)."""
    batch = x.shape[0]
    feat = jnp.concatenate([x.reshape(batch, -1).astype(jnp.float32),
                            noise.reshape(batch, -1).astype(jnp.float32)], axis=1)

    bpad = packed["s1"].shape[2]        # padded input rows (multiple of 8)
    cin_pad = packed["m1"].shape[0]     # padded input lanes (multiple of 128)
    # packed S/M are baked for a specific batch — fail loudly on mismatch.
    assert packed["s1"].shape[1] == 2 * batch, "packed params built for a different batch"
    assert feat.shape[1] <= cin_pad
    inp = jnp.zeros((bpad, cin_pad), jnp.float32).at[:batch, :feat.shape[1]].set(feat)

    order = ["m1", "s1", "g1", "b1", "f1", "t1",
             "m2", "s2", "g2", "b2", "f2", "t2",
             "m3", "s3", "g3", "b3", "f3", "t3",
             "m4", "s4", "g4", "b4", "f4", "t4",
             "m5", "s5"]
    args = [inp] + [packed[k] for k in order]

    rows, cols = 32 * batch, 128
    out2d = pl.pallas_call(
        _netg_kernel,
        out_shape=jax.ShapeDtypeStruct((rows, cols), jnp.float32),
        in_specs=[_full_spec(a.shape) for a in args],
        out_specs=_full_spec((rows, cols)),
    )(*args)

    # rows=(b, y), cols=(x, c_pad) -> drop padded channel -> NCHW (B, 3, 32, 32).
    return out2d.reshape(batch, 32, 32, 4)[:, :, :, :3].transpose(0, 3, 1, 2)


# ----------------------- pure-JAX reference (for checking) -------------------

def _ref_conv_transpose(x, w, stride, padding):
    b, cin, h, wd = x.shape
    _, cout, k, _ = w.shape
    cols = jnp.einsum("bihw,iojk->bojkhw", x, w)
    hf = (h - 1) * stride + k
    wf = (wd - 1) * stride + k
    full = jnp.zeros((b, cout, hf, wf), jnp.float32)
    for ki in range(k):
        for kj in range(k):
            full = full.at[:, :,
                           ki:ki + (h - 1) * stride + 1:stride,
                           kj:kj + (wd - 1) * stride + 1:stride].add(cols[:, :, ki, kj])
    return full[:, :, padding:hf - padding, padding:wf - padding]


def _ref_bn_relu(x, g, b):
    mean = jnp.mean(x, axis=(0, 2, 3), keepdims=True)
    var = jnp.mean(jnp.square(x - mean), axis=(0, 2, 3), keepdims=True)
    y = (x - mean) * jax.lax.rsqrt(var + 1e-5)
    y = y * g.reshape(1, -1, 1, 1) + b.reshape(1, -1, 1, 1)
    return jnp.maximum(y, 0.0)


def ref_forward(raw, x, noise):
    batch = x.shape[0]
    h = jnp.concatenate([x.reshape(batch, -1, 1, 1), noise], axis=1)
    h = _ref_bn_relu(_ref_conv_transpose(h, raw["w1"], 1, 0), raw["g1"], raw["b1"])
    h = _ref_bn_relu(_ref_conv_transpose(h, raw["w2"], 2, 1), raw["g2"], raw["b2"])
    h = _ref_bn_relu(_ref_conv_transpose(h, raw["w3"], 2, 1), raw["g3"], raw["b3"])
    h = _ref_bn_relu(_ref_conv_transpose(h, raw["w4"], 2, 1), raw["g4"], raw["b4"])
    return jnp.tanh(_ref_conv_transpose(h, raw["w5"], 2, 1))


# ----------------------------------- main ------------------------------------

if __name__ == "__main__":
    ndf, ngf, nz, nclasses = 4, 8, 16, 10
    batch = 2

    key = jax.random.PRNGKey(0)
    k_params, k_x, k_noise = jax.random.split(key, 3)

    raw = init_netg_params(k_params, ndf, ngf, nz, nclasses)
    packed = pack_netg_params(raw, batch)

    # "input" feature vector (viewed to (B, 2*ndf+nclasses+1, 1, 1) inside forward)
    x = jax.random.normal(k_x, (batch, ndf * 2 + nclasses + 1), dtype=jnp.float32)
    # noise ~ N(0, 1); torch draws it inside forward — here it is an explicit input.
    noise = jax.random.normal(k_noise, (batch, nz, 1, 1), dtype=jnp.float32)

    out = netg_forward(packed, x, noise)
    out = jax.block_until_ready(out)

    assert out.shape == (batch, 3, 32, 32), out.shape
    assert bool(jnp.all(jnp.isfinite(out)))
    assert bool(jnp.all(jnp.abs(out) <= 1.0 + 1e-6))     # tanh output range

    ref = ref_forward(raw, x, noise)
    max_err = float(jnp.max(jnp.abs(out - ref)))
    assert max_err < 5e-2, f"mismatch vs reference: {max_err}"

    print("KERNEL_OK")
</pallas_src>

<mosaic_0001>
module attributes {stable_mosaic.version = 11 : i64} {
  func.func @_netg_kernel(%arg0: memref<8x128xf32, #tpu.memory_space<vmem>>, %arg1: memref<128x256xbf16, #tpu.memory_space<vmem>>, %arg2: memref<2x4x8xbf16, #tpu.memory_space<vmem>>, %arg3: memref<1x64xf32, #tpu.memory_space<vmem>>, %arg4: memref<1x64xf32, #tpu.memory_space<vmem>>, %arg5: memref<128x64xf32, #tpu.memory_space<vmem>>, %arg6: memref<64x128xf32, #tpu.memory_space<vmem>>, %arg7: memref<128x512xbf16, #tpu.memory_space<vmem>>, %arg8: memref<4x8x4xbf16, #tpu.memory_space<vmem>>, %arg9: memref<1x32xf32, #tpu.memory_space<vmem>>, %arg10: memref<1x32xf32, #tpu.memory_space<vmem>>, %arg11: memref<128x32xf32, #tpu.memory_space<vmem>>, %arg12: memref<32x128xf32, #tpu.memory_space<vmem>>, %arg13: memref<128x512xbf16, #tpu.memory_space<vmem>>, %arg14: memref<4x16x8xbf16, #tpu.memory_space<vmem>>, %arg15: memref<1x16xf32, #tpu.memory_space<vmem>>, %arg16: memref<1x16xf32, #tpu.memory_space<vmem>>, %arg17: memref<128x16xf32, #tpu.memory_space<vmem>>, %arg18: memref<16x128xf32, #tpu.memory_space<vmem>>, %arg19: memref<128x512xbf16, #tpu.memory_space<vmem>>, %arg20: memref<4x32x16xbf16, #tpu.memory_space<vmem>>, %arg21: memref<1x8xf32, #tpu.memory_space<vmem>>, %arg22: memref<1x8xf32, #tpu.memory_space<vmem>>, %arg23: memref<128x8xf32, #tpu.memory_space<vmem>>, %arg24: memref<8x128xf32, #tpu.memory_space<vmem>>, %arg25: memref<128x512xbf16, #tpu.memory_space<vmem>>, %arg26: memref<4x64x32xbf16, #tpu.memory_space<vmem>>, %arg27: memref<64x128xf32, #tpu.memory_space<vmem>>) attributes {dimension_semantics = [], scalar_prefetch = 0 : i64, scratch_operands = 0 : i64, tpu.core_type = #tpu.core_type<tc>} {
    %c0 = arith.constant 0 : index
    %c0_0 = arith.constant 0 : index
    %0 = vector.load %arg0[%c0, %c0_0] : memref<8x128xf32, #tpu.memory_space<vmem>>, vector<8x128xf32>
    %1 = arith.truncf %0 : vector<8x128xf32> to vector<8x128xbf16>
    %c0_1 = arith.constant 0 : index
    %c0_2 = arith.constant 0 : index
    %2 = vector.load %arg1[%c0_1, %c0_2] : memref<128x256xbf16, #tpu.memory_space<vmem>>, vector<128x256xbf16>
    %cst = arith.constant dense<0.000000e+00> : vector<8x256xf32>
    %3 = tpu.matmul %1, %2, %cst {dimension_numbers = #tpu.dot_dimension_numbers<[1], [0], [0], [1], [0, 0, 1, 1], [], []>} : vector<8x128xbf16>, vector<128x256xbf16>, vector<8x256xf32> -> vector<8x256xf32>
    %4 = arith.truncf %3 : vector<8x256xf32> to vector<8x256xbf16>
    %c0_3 = arith.constant 0 : index
    %c0_4 = arith.constant 0 : index
    %c0_5 = arith.constant 0 : index
    %5 = vector.load %arg2[%c0_3, %c0_4, %c0_5] : memref<2x4x8xbf16, #tpu.memory_space<vmem>>, vector<1x4x8xbf16>
    %6 = vector.shape_cast %5 : vector<1x4x8xbf16> to vector<4x8xbf16>
    %7 = vector.extract_strided_slice %4 {offsets = [0, 0], sizes = [8, 128], strides = [1, 1]} : vector<8x256xbf16> to vector<8x128xbf16>
    %cst_6 = arith.constant dense<0.000000e+00> : vector<4x128xf32>
    %8 = tpu.matmul %6, %7, %cst_6 {dimension_numbers = #tpu.dot_dimension_numbers<[1], [0], [0], [1], [0, 0, 1, 1], [], []>} : vector<4x8xbf16>, vector<8x128xbf16>, vector<4x128xf32> -> vector<4x128xf32>
    %c1 = arith.constant 1 : index
    %c0_7 = arith.constant 0 : index
    %c0_8 = arith.constant 0 : index
    %9 = vector.load %arg2[%c1, %c0_7, %c0_8] : memref<2x4x8xbf16, #tpu.memory_space<vmem>>, vector<1x4x8xbf16>
    %10 = vector.shape_cast %9 : vector<1x4x8xbf16> to vector<4x8xbf16>
    %11 = vector.extract_strided_slice %4 {offsets = [0, 128], sizes = [8, 128], strides = [1, 1]} : vector<8x256xbf16> to vector<8x128xbf16>
    %cst_9 = arith.constant dense<0.000000e+00> : vector<4x128xf32>
    %12 = tpu.matmul %10, %11, %cst_9 {dimension_numbers = #tpu.dot_dimension_numbers<[1], [0], [0], [1], [0, 0, 1, 1], [], []>} : vector<4x8xbf16>, vector<8x128xbf16>, vector<4x128xf32> -> vector<4x128xf32>
    %13 = arith.addf %8, %12 : vector<4x128xf32>
    %cst_10 = arith.constant dense<0.000000e+00> : vector<128xf32>
    %14 = vector.multi_reduction <add>, %13, %cst_10 [0] : vector<4x128xf32> to vector<128xf32>
    %15 = vector.shape_cast %14 : vector<128xf32> to vector<1x128xf32>
    %16 = arith.mulf %13, %13 : vector<4x128xf32>
    %cst_11 = arith.constant dense<0.000000e+00> : vector<128xf32>
    %17 = vector.multi_reduction <add>, %16, %cst_11 [0] : vector<4x128xf32> to vector<128xf32>
    %18 = vector.shape_cast %17 : vector<128xf32> to vector<1x128xf32>
    %c0_12 = arith.constant 0 : index
    %c0_13 = arith.constant 0 : index
    %19 = vector.load %arg5[%c0_12, %c0_13] : memref<128x64xf32, #tpu.memory_space<vmem>>, vector<128x64xf32>
    %cst_14 = arith.constant dense<0.000000e+00> : vector<1x64xf32>
    %20 = tpu.matmul %15, %19, %cst_14 {dimension_numbers = #tpu.dot_dimension_numbers<[1], [0], [0], [1], [0, 0, 1, 1], [], []>} : vector<1x128xf32>, vector<128x64xf32>, vector<1x64xf32> -> vector<1x64xf32>
    %c0_15 = arith.constant 0 : index
    %c0_16 = arith.constant 0 : index
    %21 = vector.load %arg5[%c0_15, %c0_16] : memref<128x64xf32, #tpu.memory_space<vmem>>, vector<128x64xf32>
    %cst_17 = arith.constant dense<0.000000e+00> : vector<1x64xf32>
    %22 = tpu.matmul %18, %21, %cst_17 {dimension_numbers = #tpu.dot_dimension_numbers<[1], [0], [0], [1], [0, 0, 1, 1], [], []>} : vector<1x128xf32>, vector<128x64xf32>, vector<1x64xf32> -> vector<1x64xf32>
    %cst_18 = arith.constant 8.000000e+00 : f32
    %23 = vector.broadcast %cst_18 : f32 to vector<1x64xf32>
    %24 = arith.divf %20, %23 : vector<1x64xf32>
    %cst_19 = arith.constant 8.000000e+00 : f32
    %25 = vector.broadcast %cst_19 : f32 to vector<1x64xf32>
    %26 = arith.divf %22, %25 : vector<1x64xf32>
    %27 = arith.mulf %24, %24 : vector<1x64xf32>
    %28 = arith.subf %26, %27 : vector<1x64xf32>
    %cst_20 = arith.constant 0.000000e+00 : f32
    %29 = vector.broadcast %cst_20 : f32 to vector<1x64xf32>
    %30 = arith.maximumf %28, %29 : vector<1x64xf32>
    %cst_21 = arith.constant 9.99999974E-6 : f32
    %31 = vector.broadcast %cst_21 : f32 to vector<1x64xf32>
    %32 = arith.addf %30, %31 : vector<1x64xf32>
    %33 = math.rsqrt %32 : vector<1x64xf32>
    %c0_22 = arith.constant 0 : index
    %c0_23 = arith.constant 0 : index
    %34 = vector.load %arg3[%c0_22, %c0_23] : memref<1x64xf32, #tpu.memory_space<vmem>>, vector<1x64xf32>
    %35 = arith.mulf %34, %33 : vector<1x64xf32>
    %c0_24 = arith.constant 0 : index
    %c0_25 = arith.constant 0 : index
    %36 = vector.load %arg4[%c0_24, %c0_25] : memref<1x64xf32, #tpu.memory_space<vmem>>, vector<1x64xf32>
    %37 = arith.mulf %24, %35 : vector<1x64xf32>
    %38 = arith.subf %36, %37 : vector<1x64xf32>
    %c0_26 = arith.constant 0 : index
    %c0_27 = arith.constant 0 : index
    %39 = vector.load %arg6[%c0_26, %c0_27] : memref<64x128xf32, #tpu.memory_space<vmem>>, vector<64x128xf32>
    %cst_28 = arith.constant dense<0.000000e+00> : vector<1x128xf32>
    %40 = tpu.matmul %35, %39, %cst_28 {dimension_numbers = #tpu.dot_dimension_numbers<[1], [0], [0], [1], [0, 0, 1, 1], [], []>} : vector<1x64xf32>, vector<64x128xf32>, vector<1x128xf32> -> vector<1x128xf32>
    %c0_29 = arith.constant 0 : index
    %c0_30 = arith.constant 0 : index
    %41 = vector.load %arg6[%c0_29, %c0_30] : memref<64x128xf32, #tpu.memory_space<vmem>>, vector<64x128xf32>
    %cst_31 = arith.constant dense<0.000000e+00> : vector<1x128xf32>
    %42 = tpu.matmul %38, %41, %cst_31 {dimension_numbers = #tpu.dot_dimension_numbers<[1], [0], [0], [1], [0, 0, 1, 1], [], []>} : vector<1x64xf32>, vector<64x128xf32>, vector<1x128xf32> -> vector<1x128xf32>
    %43 = vector.broadcast %40 : vector<1x128xf32> to vector<4x128xf32>
    %44 = arith.mulf %13, %43 : vector<4x128xf32>
    %45 = vector.broadcast %42 : vector<1x128xf32> to vector<4x128xf32>
    %46 = arith.addf %44, %45 : vector<4x128xf32>
    %cst_32 = arith.constant 0.000000e+00 : f32
    %47 = vector.broadcast %cst_32 : f32 to vector<4x128xf32>
    %48 = arith.maximumf %46, %47 : vector<4x128xf32>
    %49 = arith.truncf %48 : vector<4x128xf32> to vector<4x128xbf16>
    %c0_33 = arith.constant 0 : index
    %c0_34 = arith.constant 0 : index
    %50 = vector.load %arg7[%c0_33, %c0_34] : memref<128x512xbf16, #tpu.memory_space<vmem>>, vector<128x512xbf16>
    %cst_35 = arith.constant dense<0.000000e+00> : vector<4x512xf32>
    %51 = tpu.matmul %49, %50, %cst_35 {dimension_numbers = #tpu.dot_dimension_numbers<[1], [0], [0], [1], [0, 0, 1, 1], [], []>} : vector<4x128xbf16>, vector<128x512xbf16>, vector<4x512xf32> -> vector<4x512xf32>
    %52 = arith.truncf %51 : vector<4x512xf32> to vector<4x512xbf16>
    %c0_36 = arith.constant 0 : index
    %c0_37 = arith.constant 0 : index
    %c0_38 = arith.constant 0 : index
    %53 = vector.load %arg8[%c0_36, %c0_37, %c0_38] : memref<4x8x4xbf16, #tpu.memory_space<vmem>>, vector<1x8x4xbf16>
    %54 = vector.shape_cast %53 : vector<1x8x4xbf16> to vector<8x4xbf16>
    %55 = vector.extract_strided_slice %52 {offsets = [0, 0], sizes = [4, 128], strides = [1, 1]} : vector<4x512xbf16> to vector<4x128xbf16>
    %cst_39 = arith.constant dense<0.000000e+00> : vector<8x128xf32>
    %56 = tpu.matmul %54, %55, %cst_39 {dimension_numbers = #tpu.dot_dimension_numbers<[1], [0], [0], [1], [0, 0, 1, 1], [], []>} : vector<8x4xbf16>, vector<4x128xbf16>, vector<8x128xf32> -> vector<8x128xf32>
    %c1_40 = arith.constant 1 : index
    %c0_41 = arith.constant 0 : index
    %c0_42 = arith.constant 0 : index
    %57 = vector.load %arg8[%c1_40, %c0_41, %c0_42] : memref<4x8x4xbf16, #tpu.memory_space<vmem>>, vector<1x8x4xbf16>
    %58 = vector.shape_cast %57 : vector<1x8x4xbf16> to vector<8x4xbf16>
    %59 = vector.extract_strided_slice %52 {offsets = [0, 128], sizes = [4, 128], strides = [1, 1]} : vector<4x512xbf16> to vector<4x128xbf16>
    %cst_43 = arith.constant dense<0.000000e+00> : vector<8x128xf32>
    %60 = tpu.matmul %58, %59, %cst_43 {dimension_numbers = #tpu.dot_dimension_numbers<[1], [0], [0], [1], [0, 0, 1, 1], [], []>} : vector<8x4xbf16>, vector<4x128xbf16>, vector<8x128xf32> -> vector<8x128xf32>
    %61 = arith.addf %56, %60 : vector<8x128xf32>
    %c2 = arith.constant 2 : index
    %c0_44 = arith.constant 0 : index
    %c0_45 = arith.constant 0 : index
    %62 = vector.load %arg8[%c2, %c0_44, %c0_45] : memref<4x8x4xbf16, #tpu.memory_space<vmem>>, vector<1x8x4xbf16>
    %63 = vector.shape_cast %62 : vector<1x8x4xbf16> to vector<8x4xbf16>
    %64 = vector.extract_strided_slice %52 {offsets = [0, 256], sizes = [4, 128], strides = [1, 1]} : vector<4x512xbf16> to vector<4x128xbf16>
    %cst_46 = arith.constant dense<0.000000e+00> : vector<8x128xf32>
    %65 = tpu.matmul %63, %64, %cst_46 {dimension_numbers = #tpu.dot_dimension_numbers<[1], [0], [0], [1], [0, 0, 1, 1], [], []>} : vector<8x4xbf16>, vector<4x128xbf16>, vector<8x128xf32> -> vector<8x128xf32>
    %66 = arith.addf %61, %65 : vector<8x128xf32>
    %c3 = arith.constant 3 : index
    %c0_47 = arith.constant 0 : index
    %c0_48 = arith.constant 0 : index
    %67 = vector.load %arg8[%c3, %c0_47, %c0_48] : memref<4x8x4xbf16, #tpu.memory_space<vmem>>, vector<1x8x4xbf16>
    %68 = vector.shape_cast %67 : vector<1x8x4xbf16> to vector<8x4xbf16>
    %69 = vector.extract_strided_slice %52 {offsets = [0, 384], sizes = [4, 128], strides = [1, 1]} : vector<4x512xbf16> to vector<4x128xbf16>
    %cst_49 = arith.constant dense<0.000000e+00> : vector<8x128xf32>
    %70 = tpu.matmul %68, %69, %cst_49 {dimension_numbers = #tpu.dot_dimension_numbers<[1], [0], [0], [1], [0, 0, 1, 1], [], []>} : vector<8x4xbf16>, vector<4x128xbf16>, vector<8x128xf32> -> vector<8x128xf32>
    %71 = arith.addf %66, %70 : vector<8x128xf32>
    %cst_50 = arith.constant dense<0.000000e+00> : vector<128xf32>
    %72 = vector.multi_reduction <add>, %71, %cst_50 [0] : vector<8x128xf32> to vector<128xf32>
    %73 = vector.shape_cast %72 : vector<128xf32> to vector<1x128xf32>
    %74 = arith.mulf %71, %71 : vector<8x128xf32>
    %cst_51 = arith.constant dense<0.000000e+00> : vector<128xf32>
    %75 = vector.multi_reduction <add>, %74, %cst_51 [0] : vector<8x128xf32> to vector<128xf32>
    %76 = vector.shape_cast %75 : vector<128xf32> to vector<1x128xf32>
    %c0_52 = arith.constant 0 : index
    %c0_53 = arith.constant 0 : index
    %77 = vector.load %arg11[%c0_52, %c0_53] : memref<128x32xf32, #tpu.memory_space<vmem>>, vector<128x32xf32>
    %cst_54 = arith.constant dense<0.000000e+00> : vector<1x32xf32>
    %78 = tpu.matmul %73, %77, %cst_54 {dimension_numbers = #tpu.dot_dimension_numbers<[1], [0], [0], [1], [0, 0, 1, 1], [], []>} : vector<1x128xf32>, vector<128x32xf32>, vector<1x32xf32> -> vector<1x32xf32>
    %c0_55 = arith.constant 0 : index
    %c0_56 = arith.constant 0 : index
    %79 = vector.load %arg11[%c0_55, %c0_56] : memref<128x32xf32, #tpu.memory_space<vmem>>, vector<128x32xf32>
    %cst_57 = arith.constant dense<0.000000e+00> : vector<1x32xf32>
    %80 = tpu.matmul %76, %79, %cst_57 {dimension_numbers = #tpu.dot_dimension_numbers<[1], [0], [0], [1], [0, 0, 1, 1], [], []>} : vector<1x128xf32>, vector<128x32xf32>, vector<1x32xf32> -> vector<1x32xf32>
    %cst_58 = arith.constant 3.200000e+01 : f32
    %81 = vector.broadcast %cst_58 : f32 to vector<1x32xf32>
    %82 = arith.divf %78, %81 : vector<1x32xf32>
    %cst_59 = arith.constant 3.200000e+01 : f32
    %83 = vector.broadcast %cst_59 : f32 to vector<1x32xf32>
    %84 = arith.divf %80, %83 : vector<1x32xf32>
    %85 = arith.mulf %82, %82 : vector<1x32xf32>
    %86 = arith.subf %84, %85 : vector<1x32xf32>
    %cst_60 = arith.constant 0.000000e+00 : f32
    %87 = vector.broadcast %cst_60 : f32 to vector<1x32xf32>
    %88 = arith.maximumf %86, %87 : vector<1x32xf32>
    %cst_61 = arith.constant 9.99999974E-6 : f32
    %89 = vector.broadcast %cst_61 : f32 to vector<1x32xf32>
    %90 = arith.addf %88, %89 : vector<1x32xf32>
    %91 = math.rsqrt %90 : vector<1x32xf32>
    %c0_62 = arith.constant 0 : index
    %c0_63 = arith.constant 0 : index
    %92 = vector.load %arg9[%c0_62, %c0_63] : memref<1x32xf32, #tpu.memory_space<vmem>>, vector<1x32xf32>
    %93 = arith.mulf %92, %91 : vector<1x32xf32>
    %c0_64 = arith.constant 0 : index
    %c0_65 = arith.constant 0 : index
    %94 = vector.load %arg10[%c0_64, %c0_65] : memref<1x32xf32, #tpu.memory_space<vmem>>, vector<1x32xf32>
    %95 = arith.mulf %82, %93 : vector<1x32xf32>
    %96 = arith.subf %94, %95 : vector<1x32xf32>
    %c0_66 = arith.constant 0 : index
    %c0_67 = arith.constant 0 : index
    %97 = vector.load %arg12[%c0_66, %c0_67] : memref<32x128xf32, #tpu.memory_space<vmem>>, vector<32x128xf32>
    %cst_68 = arith.constant dense<0.000000e+00> : vector<1x128xf32>
    %98 = tpu.matmul %93, %97, %cst_68 {dimension_numbers = #tpu.dot_dimension_numbers<[1], [0], [0], [1], [0, 0, 1, 1], [], []>} : vector<1x32xf32>, vector<32x128xf32>, vector<1x128xf32> -> vector<1x128xf32>
    %c0_69 = arith.constant 0 : index
    %c0_70 = arith.constant 0 : index
    %99 = vector.load %arg12[%c0_69, %c0_70] : memref<32x128xf32, #tpu.memory_space<vmem>>, vector<32x128xf32>
    %cst_71 = arith.constant dense<0.000000e+00> : vector<1x128xf32>
    %100 = tpu.matmul %96, %99, %cst_71 {dimension_numbers = #tpu.dot_dimension_numbers<[1], [0], [0], [1], [0, 0, 1, 1], [], []>} : vector<1x32xf32>, vector<32x128xf32>, vector<1x128xf32> -> vector<1x128xf32>
    %101 = vector.broadcast %98 : vector<1x128xf32> to vector<8x128xf32>
    %102 = arith.mulf %71, %101 : vector<8x128xf32>
    %103 = vector.broadcast %100 : vector<1x128xf32> to vector<8x128xf32>
    %104 = arith.addf %102, %103 : vector<8x128xf32>
    %cst_72 = arith.constant 0.000000e+00 : f32
    %105 = vector.broadcast %cst_72 : f32 to vector<8x128xf32>
    %106 = arith.maximumf %104, %105 : vector<8x128xf32>
    %107 = arith.truncf %106 : vector<8x128xf32> to vector<8x128xbf16>
    %c0_73 = arith.constant 0 : index
    %c0_74 = arith.constant 0 : index
    %108 = vector.load %arg13[%c0_73, %c0_74] : memref<128x512xbf16, #tpu.memory_space<vmem>>, vector<128x512xbf16>
    %cst_75 = arith.constant dense<0.000000e+00> : vector<8x512xf32>
    %109 = tpu.matmul %107, %108, %cst_75 {dimension_numbers = #tpu.dot_dimension_numbers<[1], [0], [0], [1], [0, 0, 1, 1], [], []>} : vector<8x128xbf16>, vector<128x512xbf16>, vector<8x512xf32> -> vector<8x512xf32>
    %110 = arith.truncf %109 : vector<8x512xf32> to vector<8x512xbf16>
    %c0_76 = arith.constant 0 : index
    %c0_77 = arith.constant 0 : index
    %c0_78 = arith.constant 0 : index
    %111 = vector.load %arg14[%c0_76, %c0_77, %c0_78] : memref<4x16x8xbf16, #tpu.memory_space<vmem>>, vector<1x16x8xbf16>
    %112 = vector.shape_cast %111 : vector<1x16x8xbf16> to vector<16x8xbf16>
    %113 = vector.extract_strided_slice %110 {offsets = [0, 0], sizes = [8, 128], strides = [1, 1]} : vector<8x512xbf16> to vector<8x128xbf16>
    %cst_79 = arith.constant dense<0.000000e+00> : vector<16x128xf32>
    %114 = tpu.matmul %112, %113, %cst_79 {dimension_numbers = #tpu.dot_dimension_numbers<[1], [0], [0], [1], [0, 0, 1, 1], [], []>} : vector<16x8xbf16>, vector<8x128xbf16>, vector<16x128xf32> -> vector<16x128xf32>
    %c1_80 = arith.constant 1 : index
    %c0_81 = arith.constant 0 : index
    %c0_82 = arith.constant 0 : index
    %115 = vector.load %arg14[%c1_80, %c0_81, %c0_82] : memref<4x16x8xbf16, #tpu.memory_space<vmem>>, vector<1x16x8xbf16>
    %116 = vector.shape_cast %115 : vector<1x16x8xbf16> to vector<16x8xbf16>
    %117 = vector.extract_strided_slice %110 {offsets = [0, 128], sizes = [8, 128], strides = [1, 1]} : vector<8x512xbf16> to vector<8x128xbf16>
    %cst_83 = arith.constant dense<0.000000e+00> : vector<16x128xf32>
    %118 = tpu.matmul %116, %117, %cst_83 {dimension_numbers = #tpu.dot_dimension_numbers<[1], [0], [0], [1], [0, 0, 1, 1], [], []>} : vector<16x8xbf16>, vector<8x128xbf16>, vector<16x128xf32> -> vector<16x128xf32>
    %119 = arith.addf %114, %118 : vector<16x128xf32>
    %c2_84 = arith.constant 2 : index
    %c0_85 = arith.constant 0 : index
    %c0_86 = arith.constant 0 : index
    %120 = vector.load %arg14[%c2_84, %c0_85, %c0_86] : memref<4x16x8xbf16, #tpu.memory_space<vmem>>, vector<1x16x8xbf16>
    %121 = vector.shape_cast %120 : vector<1x16x8xbf16> to vector<16x8xbf16>
    %122 = vector.extract_strided_slice %110 {offsets = [0, 256], sizes = [8, 128], strides = [1, 1]} : vector<8x512xbf16> to vector<8x128xbf16>
    %cst_87 = arith.constant dense<0.000000e+00> : vector<16x128xf32>
    %123 = tpu.matmul %121, %122, %cst_87 {dimension_numbers = #tpu.dot_dimension_numbers<[1], [0], [0], [1], [0, 0, 1, 1], [], []>} : vector<16x8xbf16>, vector<8x128xbf16>, vector<16x128xf32> -> vector<16x128xf32>
    %124 = arith.addf %119, %123 : vector<16x128xf32>
    %c3_88 = arith.constant 3 : index
    %c0_89 = arith.constant 0 : index
    %c0_90 = arith.constant 0 : index
    %125 = vector.load %arg14[%c3_88, %c0_89, %c0_90] : memref<4x16x8xbf16, #tpu.memory_space<vmem>>, vector<1x16x8xbf16>
    %126 = vector.shape_cast %125 : vector<1x16x8xbf16> to vector<16x8xbf16>
    %127 = vector.extract_strided_slice %110 {offsets = [0, 384], sizes = [8, 128], strides = [1, 1]} : vector<8x512xbf16> to vector<8x128xbf16>
    %cst_91 = arith.constant dense<0.000000e+00> : vector<16x128xf32>
    %128 = tpu.matmul %126, %127, %cst_91 {dimension_numbers = #tpu.dot_dimension_numbers<[1], [0], [0], [1], [0, 0, 1, 1], [], []>} : vector<16x8xbf16>, vector<8x128xbf16>, vector<16x128xf32> -> vector<16x128xf32>
    %129 = arith.addf %124, %128 : vector<16x128xf32>
    %cst_92 = arith.constant dense<0.000000e+00> : vector<128xf32>
    %130 = vector.multi_reduction <add>, %129, %cst_92 [0] : vector<16x128xf32> to vector<128xf32>
    %131 = vector.shape_cast %130 : vector<128xf32> to vector<1x128xf32>
    %132 = arith.mulf %129, %129 : vector<16x128xf32>
    %cst_93 = arith.constant dense<0.000000e+00> : vector<128xf32>
    %133 = vector.multi_reduction <add>, %132, %cst_93 [0] : vector<16x128xf32> to vector<128xf32>
    %134 = vector.shape_cast %133 : vector<128xf32> to vector<1x128xf32>
    %c0_94 = arith.constant 0 : index
    %c0_95 = arith.constant 0 : index
    %135 = vector.load %arg17[%c0_94, %c0_95] : memref<128x16xf32, #tpu.memory_space<vmem>>, vector<128x16xf32>
    %cst_96 = arith.constant dense<0.000000e+00> : vector<1x16xf32>
    %136 = tpu.matmul %131, %135, %cst_96 {dimension_numbers = #tpu.dot_dimension_numbers<[1], [0], [0], [1], [0, 0, 1, 1], [], []>} : vector<1x128xf32>, vector<128x16xf32>, vector<1x16xf32> -> vector<1x16xf32>
    %c0_97 = arith.constant 0 : index
    %c0_98 = arith.constant 0 : index
    %137 = vector.load %arg17[%c0_97, %c0_98] : memref<128x16xf32, #tpu.memory_space<vmem>>, vector<128x16xf32>
    %cst_99 = arith.constant dense<0.000000e+00> : vector<1x16xf32>
    %138 = tpu.matmul %134, %137, %cst_99 {dimension_numbers = #tpu.dot_dimension_numbers<[1], [0], [0], [1], [0, 0, 1, 1], [], []>} : vector<1x128xf32>, vector<128x16xf32>, vector<1x16xf32> -> vector<1x16xf32>
    %cst_100 = arith.constant 1.280000e+02 : f32
    %139 = vector.broadcast %cst_100 : f32 to vector<1x16xf32>
    %140 = arith.divf %136, %139 : vector<1x16xf32>
    %cst_101 = arith.constant 1.280000e+02 : f32
    %141 = vector.broadcast %cst_101 : f32 to vector<1x16xf32>
    %142 = arith.divf %138, %141 : vector<1x16xf32>
    %143 = arith.mulf %140, %140 : vector<1x16xf32>
    %144 = arith.subf %142, %143 : vector<1x16xf32>
    %cst_102 = arith.constant 0.000000e+00 : f32
    %145 = vector.broadcast %cst_102 : f32 to vector<1x16xf32>
    %146 = arith.maximumf %144, %145 : vector<1x16xf32>
    %cst_103 = arith.constant 9.99999974E-6 : f32
    %147 = vector.broadcast %cst_103 : f32 to vector<1x16xf32>
    %148 = arith.addf %146, %147 : vector<1x16xf32>
    %149 = math.rsqrt %148 : vector<1x16xf32>
    %c0_104 = arith.constant 0 : index
    %c0_105 = arith.constant 0 : index
    %150 = vector.load %arg15[%c0_104, %c0_105] : memref<1x16xf32, #tpu.memory_space<vmem>>, vector<1x16xf32>
    %151 = arith.mulf %150, %149 : vector<1x16xf32>
    %c0_106 = arith.constant 0 : index
    %c0_107 = arith.constant 0 : index
    %152 = vector.load %arg16[%c0_106, %c0_107] : memref<1x16xf32, #tpu.memory_space<vmem>>, vector<1x16xf32>
    %153 = arith.mulf %140, %151 : vector<1x16xf32>
    %154 = arith.subf %152, %153 : vector<1x16xf32>
    %c0_108 = arith.constant 0 : index
    %c0_109 = arith.constant 0 : index
    %155 = vector.load %arg18[%c0_108, %c0_109] : memref<16x128xf32, #tpu.memory_space<vmem>>, vector<16x128xf32>
    %cst_110 = arith.constant dense<0.000000e+00> : vector<1x128xf32>
    %156 = tpu.matmul %151, %155, %cst_110 {dimension_numbers = #tpu.dot_dimension_numbers<[1], [0], [0], [1], [0, 0, 1, 1], [], []>} : vector<1x16xf32>, vector<16x128xf32>, vector<1x128xf32> -> vector<1x128xf32>
    %c0_111 = arith.constant 0 : index
    %c0_112 = arith.constant 0 : index
    %157 = vector.load %arg18[%c0_111, %c0_112] : memref<16x128xf32, #tpu.memory_space<vmem>>, vector<16x128xf32>
    %cst_113 = arith.constant dense<0.000000e+00> : vector<1x128xf32>
    %158 = tpu.matmul %154, %157, %cst_113 {dimension_numbers = #tpu.dot_dimension_numbers<[1], [0], [0], [1], [0, 0, 1, 1], [], []>} : vector<1x16xf32>, vector<16x128xf32>, vector<1x128xf32> -> vector<1x128xf32>
    %159 = vector.broadcast %156 : vector<1x128xf32> to vector<16x128xf32>
    %160 = arith.mulf %129, %159 : vector<16x128xf32>
    %161 = vector.broadcast %158 : vector<1x128xf32> to vector<16x128xf32>
    %162 = arith.addf %160, %161 : vector<16x128xf32>
    %cst_114 = arith.constant 0.000000e+00 : f32
    %163 = vector.broadcast %cst_114 : f32 to vector<16x128xf32>
    %164 = arith.maximumf %162, %163 : vector<16x128xf32>
    %165 = arith.truncf %164 : vector<16x128xf32> to vector<16x128xbf16>
    %c0_115 = arith.constant 0 : index
    %c0_116 = arith.constant 0 : index
    %166 = vector.load %arg19[%c0_115, %c0_116] : memref<128x512xbf16, #tpu.memory_space<vmem>>, vector<128x512xbf16>
    %cst_117 = arith.constant dense<0.000000e+00> : vector<16x512xf32>
    %167 = tpu.matmul %165, %166, %cst_117 {dimension_numbers = #tpu.dot_dimension_numbers<[1], [0], [0], [1], [0, 0, 1, 1], [], []>} : vector<16x128xbf16>, vector<128x512xbf16>, vector<16x512xf32> -> vector<16x512xf32>
    %168 = arith.truncf %167 : vector<16x512xf32> to vector<16x512xbf16>
    %c0_118 = arith.constant 0 : index
    %c0_119 = arith.constant 0 : index
    %c0_120 = arith.constant 0 : index
    %169 = vector.load %arg20[%c0_118, %c0_119, %c0_120] : memref<4x32x16xbf16, #tpu.memory_space<vmem>>, vector<1x32x16xbf16>
    %170 = vector.shape_cast %169 : vector<1x32x16xbf16> to vector<32x16xbf16>
    %171 = vector.extract_strided_slice %168 {offsets = [0, 0], sizes = [16, 128], strides = [1, 1]} : vector<16x512xbf16> to vector<16x128xbf16>
    %cst_121 = arith.constant dense<0.000000e+00> : vector<32x128xf32>
    %172 = tpu.matmul %170, %171, %cst_121 {dimension_numbers = #tpu.dot_dimension_numbers<[1], [0], [0], [1], [0, 0, 1, 1], [], []>} : vector<32x16xbf16>, vector<16x128xbf16>, vector<32x128xf32> -> vector<32x128xf32>
    %c1_122 = arith.constant 1 : index
    %c0_123 = arith.constant 0 : index
    %c0_124 = arith.constant 0 : index
    %173 = vector.load %arg20[%c1_122, %c0_123, %c0_124] : memref<4x32x16xbf16, #tpu.memory_space<vmem>>, vector<1x32x16xbf16>
    %174 = vector.shape_cast %173 : vector<1x32x16xbf16> to vector<32x16xbf16>
    %175 = vector.extract_strided_slice %168 {offsets = [0, 128], sizes = [16, 128], strides = [1, 1]} : vector<16x512xbf16> to vector<16x128xbf16>
    %cst_125 = arith.constant dense<0.000000e+00> : vector<32x128xf32>
    %176 = tpu.matmul %174, %175, %cst_125 {dimension_numbers = #tpu.dot_dimension_numbers<[1], [0], [0], [1], [0, 0, 1, 1], [], []>} : vector<32x16xbf16>, vector<16x128xbf16>, vector<32x128xf32> -> vector<32x128xf32>
    %177 = arith.addf %172, %176 : vector<32x128xf32>
    %c2_126 = arith.constant 2 : index
    %c0_127 = arith.constant 0 : index
    %c0_128 = arith.constant 0 : index
    %178 = vector.load %arg20[%c2_126, %c0_127, %c0_128] : memref<4x32x16xbf16, #tpu.memory_space<vmem>>, vector<1x32x16xbf16>
    %179 = vector.shape_cast %178 : vector<1x32x16xbf16> to vector<32x16xbf16>
    %180 = vector.extract_strided_slice %168 {offsets = [0, 256], sizes = [16, 128], strides = [1, 1]} : vector<16x512xbf16> to vector<16x128xbf16>
    %cst_129 = arith.constant dense<0.000000e+00> : vector<32x128xf32>
    %181 = tpu.matmul %179, %180, %cst_129 {dimension_numbers = #tpu.dot_dimension_numbers<[1], [0], [0], [1], [0, 0, 1, 1], [], []>} : vector<32x16xbf16>, vector<16x128xbf16>, vector<32x128xf32> -> vector<32x128xf32>
    %182 = arith.addf %177, %181 : vector<32x128xf32>
    %c3_130 = arith.constant 3 : index
    %c0_131 = arith.constant 0 : index
    %c0_132 = arith.constant 0 : index
    %183 = vector.load %arg20[%c3_130, %c0_131, %c0_132] : memref<4x32x16xbf16, #tpu.memory_space<vmem>>, vector<1x32x16xbf16>
    %184 = vector.shape_cast %183 : vector<1x32x16xbf16> to vector<32x16xbf16>
    %185 = vector.extract_strided_slice %168 {offsets = [0, 384], sizes = [16, 128], strides = [1, 1]} : vector<16x512xbf16> to vector<16x128xbf16>
    %cst_133 = arith.constant dense<0.000000e+00> : vector<32x128xf32>
    %186 = tpu.matmul %184, %185, %cst_133 {dimension_numbers = #tpu.dot_dimension_numbers<[1], [0], [0], [1], [0, 0, 1, 1], [], []>} : vector<32x16xbf16>, vector<16x128xbf16>, vector<32x128xf32> -> vector<32x128xf32>
    %187 = arith.addf %182, %186 : vector<32x128xf32>
    %cst_134 = arith.constant dense<0.000000e+00> : vector<128xf32>
    %188 = vector.multi_reduction <add>, %187, %cst_134 [0] : vector<32x128xf32> to vector<128xf32>
    %189 = vector.shape_cast %188 : vector<128xf32> to vector<1x128xf32>
    %190 = arith.mulf %187, %187 : vector<32x128xf32>
    %cst_135 = arith.constant dense<0.000000e+00> : vector<128xf32>
    %191 = vector.multi_reduction <add>, %190, %cst_135 [0] : vector<32x128xf32> to vector<128xf32>
    %192 = vector.shape_cast %191 : vector<128xf32> to vector<1x128xf32>
    %c0_136 = arith.constant 0 : index
    %c0_137 = arith.constant 0 : index
    %193 = vector.load %arg23[%c0_136, %c0_137] : memref<128x8xf32, #tpu.memory_space<vmem>>, vector<128x8xf32>
    %cst_138 = arith.constant dense<0.000000e+00> : vector<1x8xf32>
    %194 = tpu.matmul %189, %193, %cst_138 {dimension_numbers = #tpu.dot_dimension_numbers<[1], [0], [0], [1], [0, 0, 1, 1], [], []>} : vector<1x128xf32>, vector<128x8xf32>, vector<1x8xf32> -> vector<1x8xf32>
    %c0_139 = arith.constant 0 : index
    %c0_140 = arith.constant 0 : index
    %195 = vector.load %arg23[%c0_139, %c0_140] : memref<128x8xf32, #tpu.memory_space<vmem>>, vector<128x8xf32>
    %cst_141 = arith.constant dense<0.000000e+00> : vector<1x8xf32>
    %196 = tpu.matmul %192, %195, %cst_141 {dimension_numbers = #tpu.dot_dimension_numbers<[1], [0], [0], [1], [0, 0, 1, 1], [], []>} : vector<1x128xf32>, vector<128x8xf32>, vector<1x8xf32> -> vector<1x8xf32>
    %cst_142 = arith.constant 5.120000e+02 : f32
    %197 = vector.broadcast %cst_142 : f32 to vector<1x8xf32>
    %198 = arith.divf %194, %197 : vector<1x8xf32>
    %cst_143 = arith.constant 5.120000e+02 : f32
    %199 = vector.broadcast %cst_143 : f32 to vector<1x8xf32>
    %200 = arith.divf %196, %199 : vector<1x8xf32>
    %201 = arith.mulf %198, %198 : vector<1x8xf32>
    %202 = arith.subf %200, %201 : vector<1x8xf32>
    %cst_144 = arith.constant 0.000000e+00 : f32
    %203 = vector.broadcast %cst_144 : f32 to vector<1x8xf32>
    %204 = arith.maximumf %202, %203 : vector<1x8xf32>
    %cst_145 = arith.constant 9.99999974E-6 : f32
    %205 = vector.broadcast %cst_145 : f32 to vector<1x8xf32>
    %206 = arith.addf %204, %205 : vector<1x8xf32>
    %207 = math.rsqrt %206 : vector<1x8xf32>
    %c0_146 = arith.constant 0 : index
    %c0_147 = arith.constant 0 : index
    %208 = vector.load %arg21[%c0_146, %c0_147] : memref<1x8xf32, #tpu.memory_space<vmem>>, vector<1x8xf32>
    %209 = arith.mulf %208, %207 : vector<1x8xf32>
    %c0_148 = arith.constant 0 : index
    %c0_149 = arith.constant 0 : index
    %210 = vector.load %arg22[%c0_148, %c0_149] : memref<1x8xf32, #tpu.memory_space<vmem>>, vector<1x8xf32>
    %211 = arith.mulf %198, %209 : vector<1x8xf32>
    %212 = arith.subf %210, %211 : vector<1x8xf32>
    %c0_150 = arith.constant 0 : index
    %c0_151 = arith.constant 0 : index
    %213 = vector.load %arg24[%c0_150, %c0_151] : memref<8x128xf32, #tpu.memory_space<vmem>>, vector<8x128xf32>
    %cst_152 = arith.constant dense<0.000000e+00> : vector<1x128xf32>
    %214 = tpu.matmul %209, %213, %cst_152 {dimension_numbers = #tpu.dot_dimension_numbers<[1], [0], [0], [1], [0, 0, 1, 1], [], []>} : vector<1x8xf32>, vector<8x128xf32>, vector<1x128xf32> -> vector<1x128xf32>
    %c0_153 = arith.constant 0 : index
    %c0_154 = arith.constant 0 : index
    %215 = vector.load %arg24[%c0_153, %c0_154] : memref<8x128xf32, #tpu.memory_space<vmem>>, vector<8x128xf32>
    %cst_155 = arith.constant dense<0.000000e+00> : vector<1x128xf32>
    %216 = tpu.matmul %212, %215, %cst_155 {dimension_numbers = #tpu.dot_dimension_numbers<[1], [0], [0], [1], [0, 0, 1, 1], [], []>} : vector<1x8xf32>, vector<8x128xf32>, vector<1x128xf32> -> vector<1x128xf32>
    %217 = vector.broadcast %214 : vector<1x128xf32> to vector<32x128xf32>
    %218 = arith.mulf %187, %217 : vector<32x128xf32>
    %219 = vector.broadcast %216 : vector<1x128xf32> to vector<32x128xf32>
    %220 = arith.addf %218, %219 : vector<32x128xf32>
    %cst_156 = arith.constant 0.000000e+00 : f32
    %221 = vector.broadcast %cst_156 : f32 to vector<32x128xf32>
    %222 = arith.maximumf %220, %221 : vector<32x128xf32>
    %223 = arith.truncf %222 : vector<32x128xf32> to vector<32x128xbf16>
    %c0_157 = arith.constant 0 : index
    %c0_158 = arith.constant 0 : index
    %224 = vector.load %arg25[%c0_157, %c0_158] : memref<128x512xbf16, #tpu.memory_space<vmem>>, vector<128x512xbf16>
    %cst_159 = arith.constant dense<0.000000e+00> : vector<32x512xf32>
    %225 = tpu.matmul %223, %224, %cst_159 {dimension_numbers = #tpu.dot_dimension_numbers<[1], [0], [0], [1], [0, 0, 1, 1], [], []>} : vector<32x128xbf16>, vector<128x512xbf16>, vector<32x512xf32> -> vector<32x512xf32>
    %226 = arith.truncf %225 : vector<32x512xf32> to vector<32x512xbf16>
    %c0_160 = arith.constant 0 : index
    %c0_161 = arith.constant 0 : index
    %c0_162 = arith.constant 0 : index
    %227 = vector.load %arg26[%c0_160, %c0_161, %c0_162] : memref<4x64x32xbf16, #tpu.memory_space<vmem>>, vector<1x64x32xbf16>
    %228 = vector.shape_cast %227 : vector<1x64x32xbf16> to vector<64x32xbf16>
    %229 = vector.extract_strided_slice %226 {offsets = [0, 0], sizes = [32, 128], strides = [1, 1]} : vector<32x512xbf16> to vector<32x128xbf16>
    %cst_163 = arith.constant dense<0.000000e+00> : vector<64x128xf32>
    %230 = tpu.matmul %228, %229, %cst_163 {dimension_numbers = #tpu.dot_dimension_numbers<[1], [0], [0], [1], [0, 0, 1, 1], [], []>} : vector<64x32xbf16>, vector<32x128xbf16>, vector<64x128xf32> -> vector<64x128xf32>
    %c1_164 = arith.constant 1 : index
    %c0_165 = arith.constant 0 : index
    %c0_166 = arith.constant 0 : index
    %231 = vector.load %arg26[%c1_164, %c0_165, %c0_166] : memref<4x64x32xbf16, #tpu.memory_space<vmem>>, vector<1x64x32xbf16>
    %232 = vector.shape_cast %231 : vector<1x64x32xbf16> to vector<64x32xbf16>
    %233 = vector.extract_strided_slice %226 {offsets = [0, 128], sizes = [32, 128], strides = [1, 1]} : vector<32x512xbf16> to vector<32x128xbf16>
    %cst_167 = arith.constant dense<0.000000e+00> : vector<64x128xf32>
    %234 = tpu.matmul %232, %233, %cst_167 {dimension_numbers = #tpu.dot_dimension_numbers<[1], [0], [0], [1], [0, 0, 1, 1], [], []>} : vector<64x32xbf16>, vector<32x128xbf16>, vector<64x128xf32> -> vector<64x128xf32>
    %235 = arith.addf %230, %234 : vector<64x128xf32>
    %c2_168 = arith.constant 2 : index
    %c0_169 = arith.constant 0 : index
    %c0_170 = arith.constant 0 : index
    %236 = vector.load %arg26[%c2_168, %c0_169, %c0_170] : memref<4x64x32xbf16, #tpu.memory_space<vmem>>, vector<1x64x32xbf16>
    %237 = vector.shape_cast %236 : vector<1x64x32xbf16> to vector<64x32xbf16>
    %238 = vector.extract_strided_slice %226 {offsets = [0, 256], sizes = [32, 128], strides = [1, 1]} : vector<32x512xbf16> to vector<32x128xbf16>
    %cst_171 = arith.constant dense<0.000000e+00> : vector<64x128xf32>
    %239 = tpu.matmul %237, %238, %cst_171 {dimension_numbers = #tpu.dot_dimension_numbers<[1], [0], [0], [1], [0, 0, 1, 1], [], []>} : vector<64x32xbf16>, vector<32x128xbf16>, vector<64x128xf32> -> vector<64x128xf32>
    %240 = arith.addf %235, %239 : vector<64x128xf32>
    %c3_172 = arith.constant 3 : index
    %c0_173 = arith.constant 0 : index
    %c0_174 = arith.constant 0 : index
    %241 = vector.load %arg26[%c3_172, %c0_173, %c0_174] : memref<4x64x32xbf16, #tpu.memory_space<vmem>>, vector<1x64x32xbf16>
    %242 = vector.shape_cast %241 : vector<1x64x32xbf16> to vector<64x32xbf16>
    %243 = vector.extract_strided_slice %226 {offsets = [0, 384], sizes = [32, 128], strides = [1, 1]} : vector<32x512xbf16> to vector<32x128xbf16>
    %cst_175 = arith.constant dense<0.000000e+00> : vector<64x128xf32>
    %244 = tpu.matmul %242, %243, %cst_175 {dimension_numbers = #tpu.dot_dimension_numbers<[1], [0], [0], [1], [0, 0, 1, 1], [], []>} : vector<64x32xbf16>, vector<32x128xbf16>, vector<64x128xf32> -> vector<64x128xf32>
    %245 = arith.addf %240, %244 : vector<64x128xf32>
    %246 = math.tanh %245 : vector<64x128xf32>
    %c0_176 = arith.constant 0 : index
    %c0_177 = arith.constant 0 : index
    %247 = vector.load %arg27[%c0_176, %c0_177] : memref<64x128xf32, #tpu.memory_space<vmem>>, vector<64x128xf32>
    tpu.vector_store %arg27[%c0_176, %c0_177], %246 {strides = array<i32>} : memref<64x128xf32, #tpu.memory_space<vmem>>, vector<64x128xf32>,
    return
  }
}

</mosaic_0001>

<bundles_post_ra>
// kernel: netg_forward.1
= control target key start
LH: loop header
LB: loop body
LE: loop exit
PB: predicated region body
PF: predicated region fallthrough
CT: control target
= control target key end

     0   :  { %s7311_s0 = inlined_call_operand.vmem [shape: f32[8,128], index: 0, kind: input, shape index: {}]   ;;  %s7312_s1 = inlined_call_operand.hbm [shape: bf16[128,256], index: 1, kind: input, shape index: {}]   ;;  %s7313_s2 = inlined_call_operand.hbm [shape: bf16[2,4,8], index: 2, kind: input, shape index: {}]   ;;  %s7314_s3 = inlined_call_operand.hbm [shape: f32[1,64], index: 3, kind: input, shape index: {}]   ;;  %s7315_s4 = inlined_call_operand.hbm [shape: f32[1,64], index: 4, kind: input, shape index: {}]   ;;  %s7316_s5 = inlined_call_operand.vmem [shape: f32[128,64], index: 5, kind: input, shape index: {}]   ;;  %s7317_s6 = inlined_call_operand.hbm [shape: f32[64,128], index: 6, kind: input, shape index: {}]   ;;  %s7318_s7 = inlined_call_operand.vmem [shape: bf16[128,512], index: 7, kind: input, shape index: {}]   ;;  %s7319_s8 = inlined_call_operand.vmem [shape: bf16[4,8,4], index: 8, kind: input, shape index: {}]   ;;  %s7320_s9 = inlined_call_operand.hbm [shape: f32[1,32], index: 9, kind: input, shape index: {}]   ;;  %s7321_s10 = inlined_call_operand.hbm [shape: f32[1,32], index: 10, kind: input, shape index: {}]   ;;  %s7322_s11 = inlined_call_operand.vmem [shape: f32[128,32], index: 11, kind: input, shape index: {}]   ;;  %s7323_s12 = inlined_call_operand.vmem [shape: f32[32,128], index: 12, kind: input, shape index: {}]   ;;  %s7324_s13 = inlined_call_operand.vmem [shape: bf16[128,512], index: 13, kind: input, shape index: {}]   ;;  %s7325_s14 = inlined_call_operand.vmem [shape: bf16[4,16,8], index: 14, kind: input, shape index: {}]   ;;  %s7326_s15 = inlined_call_operand.hbm [shape: f32[1,16], index: 15, kind: input, shape index: {}]   ;;  %s7327_s16 = inlined_call_operand.hbm [shape: f32[1,16], index: 16, kind: input, shape index: {}]   ;;  %s7328_s17 = inlined_call_operand.vmem [shape: f32[128,16], index: 17, kind: input, shape index: {}]   ;;  %s7329_s18 = inlined_call_operand.vmem [shape: f32[16,128], index: 18, kind: input, shape index: {}]   ;;  %s7330_s19 = inlined_call_operand.vmem [shape: bf16[128,512], index: 19, kind: input, shape index: {}]   ;;  %s7331_s20 = inlined_call_operand.vmem [shape: bf16[4,32,16], index: 20, kind: input, shape index: {}]   ;;  %s7332_s21 = inlined_call_operand.hbm [shape: f32[1,8], index: 21, kind: input, shape index: {}]   ;;  %s7333_s22 = inlined_call_operand.hbm [shape: f32[1,8], index: 22, kind: input, shape index: {}]   ;;  %s7334_s23 = inlined_call_operand.vmem [shape: f32[128,8], index: 23, kind: input, shape index: {}]   ;;  %s7335_s24 = inlined_call_operand.vmem [shape: f32[8,128], index: 24, kind: input, shape index: {}]   ;;  %s7336_s25 = inlined_call_operand.vmem [shape: bf16[128,512], index: 25, kind: input, shape index: {}]   ;;  %s7337_s26 = inlined_call_operand.vmem [shape: bf16[4,64,32], index: 26, kind: input, shape index: {}]   ;;  %s7338_s27 = inlined_call_operand.vmem [shape: f32[64,128], index: 27, kind: output, shape index: {}]  }
   0x1   :  { %7353 = sst [smem:[#allocation25_spill]] %s7311_s0 }
   0x2   :  { %7354 = sst [smem:[#allocation26_spill]] %s7312_s1 }
   0x3   :  { %7355 = sst [smem:[#allocation27_spill]] %s7313_s2 }
   0x4   :  { %7356 = sst [smem:[#allocation28_spill]] %s7314_s3 }
   0x5   :  { %7357 = sst [smem:[#allocation29_spill]] %s7315_s4 }
   0x6   :  { %7358 = sst [smem:[#allocation30_spill]] %s7316_s5 }
   0x7   :  { %7359 = sst [smem:[#allocation31_spill]] %s7317_s6 }
   0x8   :  { %7360 = sst [smem:[#allocation32_spill]] %s7318_s7 }
   0x9   :  { %7361 = sst [smem:[#allocation33_spill]] %s7319_s8 }
   0xa   :  { %7362 = sst [smem:[#allocation34_spill]] %s7320_s9 }
   0xb   :  { %7363 = sst [smem:[#allocation35_spill]] %s7321_s10 }
   0xc   :  { %7364 = sst [smem:[#allocation36_spill]] %s7322_s11 }
   0xd   :  { %7365 = sst [smem:[#allocation37_spill]] %s7336_s25 }
   0xe   :  { %7366 = sst [smem:[#allocation38_spill]] %s7337_s26 }
   0xf   :  { %7367 = sst [smem:[#allocation39_spill]] %s7338_s27 }
  0x10   :  { %32 = vsyncpa [#allocation3], 0 }
  0x11   :  { %33 = vsyncpa [#allocation5], 0 }
  0x12   :  { %34 = vsyncpa [#allocation8], 0 }
  0x13   :  { %35 = vsyncpa [#allocation11], 0 }
  0x14   :  { %36 = vsyncpa [#allocation14], 0 }
  0x15   :  { %37 = vsyncpa [#allocation17], 0  ;;  %s6001_s7 = smov [#allocation4]   ;;  %s7368_s9 = sld [smem:[#allocation27_spill]] }
  0x16   :  { %s57_s4 = sshll.u32 %s6001_s7, 4  ;;  %s58_s4 = int_to_ptr.vmem [resolvable:$true] %s57_s4 }
  0x1b   :  { %s5747_s5 = scalar_lea.hbm %s7368_s9, 64 }
  0x1c   :  { %p5748_p0 = scmp.ne.s32.totalorder %s7368_s9, %s5747_s5  ;;  %p5751_p1 = scmp.lt.u32.totalorder %s5747_s5, %s7368_s9 }
  0x1e   :  { %p5753_p2 = pnand %p5751_p1, %p5748_p0 }
  0x20   :  { %5756 = shalt.err (!%p5753_p2)
}
  0x21   :  { %s5757_s1 = scalar_lea.vmem %s58_s4, 64  ;;  %p5762_p4 = scmp.lt.s32.totalorder %s58_s4, %s58_s4 }
  0x22   :  { %p5758_p3 = scmp.ne.s32.totalorder %s58_s4, %s5757_s1  ;;  %p5763_p5 = scmp.lt.s32.totalorder %s5757_s1, %s5757_s1 }
  0x24   :  { %p5764_p6 = por %p5763_p5, %p5762_p4 }
  0x26   :  { %p5765_p7 = pnand %p5764_p6, %p5758_p3 }
  0x28   :  { %5768 = shalt.err (!%p5765_p7)
}
  0x29   :  { %s6002_s6 = smov 32   ;;  %s6003_s11 = smov 2  }
  0x2a   :  { %63 = dma.hbm_to_vmem [thread:$0]  %s7368_s9, 64, %s58_s4, [#allocation5], %s6002_s6, %s6002_s6, %s6003_s11  }
  0x2b   :  { %s6004_s7 = smov [#allocation7]   ;;  %s6005_s30 = smov [#allocation10]  }
  0x2c   :  { %s80_s8 = sshll.u32 %s6004_s7, 4  ;;  %s108_s5 = sshll.u32 %s6005_s30, 4  ;;  %s81_s8 = int_to_ptr.vmem [resolvable:$true] %s80_s8  ;;  %s109_s5 = int_to_ptr.vmem [resolvable:$true] %s108_s5 }
  0x2d   :  { %s7369_s10 = sld [smem:[#allocation29_spill]] }
  0x33   :  { %s5769_s29 = scalar_lea.hbm %s7369_s10, 16 }
  0x34   :  { %p5770_p8 = scmp.ne.s32.totalorder %s7369_s10, %s5769_s29  ;;  %p5773_p9 = scmp.lt.u32.totalorder %s5769_s29, %s7369_s10 }
  0x36   :  { %p5775_p10 = pnand %p5773_p9, %p5770_p8 }
  0x38   :  { %5778 = shalt.err (!%p5775_p10)
}
  0x39   :  { %s5779_s4 = scalar_lea.vmem %s81_s8, 16  ;;  %s5783_s9 = scalar_lea.vmem %s81_s8, 32 }
  0x3a   :  { %p5780_p11 = scmp.ne.s32.totalorder %s81_s8, %s5779_s4  ;;  %p5784_p12 = scmp.lt.s32.totalorder %s81_s8, %s81_s8 }
  0x3b   :  { %p5785_p13 = scmp.lt.s32.totalorder %s5783_s9, %s5779_s4 }
  0x3d   :  { %p5786_p0 = por %p5785_p13, %p5784_p12 }
  0x3f   :  { %p5787_p1 = pnand %p5786_p0, %p5780_p11 }
  0x41   :  { %5790 = shalt.err (!%p5787_p1)
}
  0x42   :  { %83 = dma.hbm_to_vmem [thread:$0]  %s7369_s10, 16, %s81_s8, [#allocation8]  }
  0x43   :  { %s7370_s3 = sld [smem:[#allocation34_spill]] }
  0x49   :  { %s5791_s25 = scalar_lea.hbm %s7370_s3, 16 }
  0x4a   :  { %p5792_p2 = scmp.ne.s32.totalorder %s7370_s3, %s5791_s25  ;;  %p5795_p3 = scmp.lt.u32.totalorder %s5791_s25, %s7370_s3 }
  0x4c   :  { %p5797_p4 = pnand %p5795_p3, %p5792_p2 }
  0x4e   :  { %5800 = shalt.err (!%p5797_p4)
}
  0x4f   :  { %s5801_s0 = scalar_lea.vmem %s109_s5, 16  ;;  %s5805_s29 = scalar_lea.vmem %s109_s5, 32 }
  0x50   :  { %p5802_p5 = scmp.ne.s32.totalorder %s109_s5, %s5801_s0  ;;  %p5806_p6 = scmp.lt.s32.totalorder %s109_s5, %s109_s5 }
  0x51   :  { %p5807_p7 = scmp.lt.s32.totalorder %s5805_s29, %s5801_s0 }
  0x53   :  { %p5808_p8 = por %p5807_p7, %p5806_p6 }
  0x55   :  { %p5809_p9 = pnand %p5808_p8, %p5802_p5 }
  0x57   :  { %5812 = shalt.err (!%p5809_p9)
}
  0x58   :  { %111 = dma.hbm_to_vmem [thread:$0]  %s7370_s3, 16, %s109_s5, [#allocation11]  }
  0x59   :  { %s6006_s1 = smov [#allocation13]   ;;  %s6007_s9 = smov [#allocation16]  }
  0x5a   :  { %s136_s4 = sshll.u32 %s6006_s1, 4  ;;  %s164_s6 = sshll.u32 %s6007_s9, 4  ;;  %s137_s4 = int_to_ptr.vmem [resolvable:$true] %s136_s4  ;;  %s165_s6 = int_to_ptr.vmem [resolvable:$true] %s164_s6 }
  0x5b   :  { %s5813_s2 = scalar_lea.hbm %s7326_s15, 16 }
  0x5c   :  { %p5814_p10 = scmp.ne.s32.totalorder %s7326_s15, %s5813_s2  ;;  %p5817_p11 = scmp.lt.u32.totalorder %s5813_s2, %s7326_s15 }
  0x5e   :  { %p5819_p12 = pnand %p5817_p11, %p5814_p10 }
  0x60   :  { %5822 = shalt.err (!%p5819_p12)
}
  0x61   :  { %s5823_s5 = scalar_lea.vmem %s137_s4, 16  ;;  %s5827_s3 = scalar_lea.vmem %s137_s4, 32 }
  0x62   :  { %p5824_p13 = scmp.ne.s32.totalorder %s137_s4, %s5823_s5  ;;  %p5828_p0 = scmp.lt.s32.totalorder %s137_s4, %s137_s4 }
  0x63   :  { %p5829_p1 = scmp.lt.s32.totalorder %s5827_s3, %s5823_s5 }
  0x65   :  { %p5830_p2 = por %p5829_p1, %p5828_p0 }
  0x67   :  { %p5831_p3 = pnand %p5830_p2, %p5824_p13 }
  0x69   :  { %5834 = shalt.err (!%p5831_p3)
}
  0x6a   :  { %139 = dma.hbm_to_vmem [thread:$0]  %s7326_s15, 16, %s137_s4, [#allocation14]  }
  0x6b   :  { %s5835_s10 = scalar_lea.hbm %s7332_s21, 16 }
  0x6c   :  { %p5836_p4 = scmp.ne.s32.totalorder %s7332_s21, %s5835_s10  ;;  %p5839_p5 = scmp.lt.u32.totalorder %s5835_s10, %s7332_s21 }
  0x6e   :  { %p5841_p6 = pnand %p5839_p5, %p5836_p4 }
  0x70   :  { %5844 = shalt.err (!%p5841_p6)
}
  0x71   :  { %s5845_s2 = scalar_lea.vmem %s165_s6, 16  ;;  %s5849_s25 = scalar_lea.vmem %s165_s6, 32 }
  0x72   :  { %p5846_p7 = scmp.ne.s32.totalorder %s165_s6, %s5845_s2  ;;  %p5850_p8 = scmp.lt.s32.totalorder %s165_s6, %s165_s6 }
  0x73   :  { %p5851_p9 = scmp.lt.s32.totalorder %s5849_s25, %s5845_s2 }
  0x75   :  { %p5852_p10 = por %p5851_p9, %p5850_p8 }
  0x77   :  { %p5853_p11 = pnand %p5852_p10, %p5846_p7 }
  0x79   :  { %5856 = shalt.err (!%p5853_p11)
}
  0x7a   :  { %167 = dma.hbm_to_vmem [thread:$0]  %s7332_s21, 16, %s165_s6, [#allocation17]  }
  0x7b   :  { %s6008_s26 = smov [#allocation2]   ;;  %s7371_s3 = sld [smem:[#allocation26_spill]] }
  0x7c   :  { %s45_s7 = sshll.u32 %s6008_s26, 4  ;;  %s46_s7 = int_to_ptr.vmem [resolvable:$true] %s45_s7 }
  0x81   :  { %s5857_s28 = scalar_lea.hbm %s7371_s3, 2048 }
  0x82   :  { %p5858_p12 = scmp.ne.s32.totalorder %s7371_s3, %s5857_s28  ;;  %p5861_p13 = scmp.lt.u32.totalorder %s5857_s28, %s7371_s3 }
  0x84   :  { %p5863_p0 = pnand %p5861_p13, %p5858_p12 }
  0x86   :  { %5866 = shalt.err (!%p5863_p0)
}
  0x87   :  { %s5867_s1 = scalar_lea.vmem %s46_s7, 2048  ;;  %p5872_p2 = scmp.lt.s32.totalorder %s46_s7, %s46_s7 }
  0x88   :  { %p5868_p1 = scmp.ne.s32.totalorder %s46_s7, %s5867_s1  ;;  %p5873_p3 = scmp.lt.s32.totalorder %s5867_s1, %s5867_s1 }
  0x8a   :  { %p5874_p4 = por %p5873_p3, %p5872_p2 }
  0x8c   :  { %p5875_p5 = pnand %p5874_p4, %p5868_p1 }
  0x8e   :  { %5878 = shalt.err (!%p5875_p5)
}
  0x8f   :  { %s6009_s21 = smov 128   ;;  %s6010_s6 = smov 8  }
  0x90   :  { %51 = dma.hbm_to_vmem [thread:$0]  %s7371_s3, 2048, %s46_s7, [#allocation3], %s6009_s21, %s6009_s21, %s6010_s6  }
  0x91   :  { %s6011_s27 = smov [#allocation6]   ;;  %s6012_s25 = smov [#allocation9]  }
  0x92   :  { %s70_s2 = sshll.u32 %s6011_s27, 4  ;;  %s91_s15 = sshll.u32 %s6012_s25, 4  ;;  %s71_s2 = int_to_ptr.vmem [resolvable:$true] %s70_s2  ;;  %s6235_s15 = int_to_ptr.vmem [resolvable:$true] %s91_s15 }
  0x93   :  { %s7372_s30 = sld [smem:[#allocation28_spill]] }
  0x99   :  { %s5879_s5 = scalar_lea.hbm %s7372_s30, 16 }
  0x9a   :  { %p5880_p6 = scmp.ne.s32.totalorder %s7372_s30, %s5879_s5  ;;  %p5883_p7 = scmp.lt.u32.totalorder %s5879_s5, %s7372_s30 }
  0x9c   :  { %p5885_p8 = pnand %p5883_p7, %p5880_p6 }
  0x9e   :  { %5888 = shalt.err (!%p5885_p8)
}
  0x9f   :  { %s5889_s7 = scalar_lea.vmem %s71_s2, 16  ;;  %s5893_s3 = scalar_lea.vmem %s71_s2, 32 }
  0xa0   :  { %p5890_p9 = scmp.ne.s32.totalorder %s71_s2, %s5889_s7  ;;  %p5894_p10 = scmp.lt.s32.totalorder %s71_s2, %s71_s2 }
  0xa1   :  { %p5895_p11 = scmp.lt.s32.totalorder %s5893_s3, %s5889_s7 }
  0xa3   :  { %p5896_p12 = por %p5895_p11, %p5894_p10 }
  0xa5   :  { %p5897_p13 = pnand %p5896_p12, %p5890_p9 }
  0xa7   :  { %5900 = shalt.err (!%p5897_p13)
}
  0xa8   :  { %73 = dma.hbm_to_vmem [thread:$0]  %s7372_s30, 16, %s71_s2, [#allocation5]  }
  0xa9   :  { %s7373_s27 = sld [smem:[#allocation31_spill]] }
  0xaf   :  { %s5901_s25 = scalar_lea.hbm %s7373_s27, 1024 }
  0xb0   :  { %p5902_p0 = scmp.ne.s32.totalorder %s7373_s27, %s5901_s25  ;;  %p5905_p1 = scmp.lt.u32.totalorder %s5901_s25, %s7373_s27 }
  0xb2   :  { %p5907_p2 = pnand %p5905_p1, %p5902_p0 }
  0xb4   :  { %5910 = shalt.err (!%p5907_p2)
}
  0xb5   :  { %s5911_s0 = scalar_lea.vmem %s6235_s15, 1024  ;;  %p5916_p4 = scmp.lt.s32.totalorder %s6235_s15, %s6235_s15 }
  0xb6   :  { %p5912_p3 = scmp.ne.s32.totalorder %s6235_s15, %s5911_s0  ;;  %p5917_p5 = scmp.lt.s32.totalorder %s5911_s0, %s5911_s0 }
  0xb8   :  { %p5918_p6 = por %p5917_p5, %p5916_p4 }
  0xba   :  { %p5919_p7 = pnand %p5918_p6, %p5912_p3 }
  0xbc   :  { %5922 = shalt.err (!%p5919_p7)
}
  0xbd   :  { %97 = dma.hbm_to_vmem [thread:$0]  %s7373_s27, 1024, %s6235_s15, [#allocation8], %s6009_s21, %s6009_s21, %s6010_s6  }
  0xbe   :  { %s6013_s29 = smov [#allocation12]   ;;  %s6014_s7 = smov [#allocation15]  }
  0xbf   :  { %s118_s8 = sshll.u32 %s6013_s29, 4  ;;  %s146_s3 = sshll.u32 %s6014_s7, 4  ;;  %s119_s8 = int_to_ptr.vmem [resolvable:$true] %s118_s8  ;;  %s147_s3 = int_to_ptr.vmem [resolvable:$true] %s146_s3 }
  0xc0   :  { %s7374_s9 = sld [smem:[#allocation35_spill]] }
  0xc6   :  { %s5923_s11 = scalar_lea.hbm %s7374_s9, 16 }
  0xc7   :  { %p5924_p8 = scmp.ne.s32.totalorder %s7374_s9, %s5923_s11  ;;  %p5927_p9 = scmp.lt.u32.totalorder %s5923_s11, %s7374_s9 }
  0xc9   :  { %p5929_p10 = pnand %p5927_p9, %p5924_p8 }
  0xcb   :  { %5932 = shalt.err (!%p5929_p10)
}
  0xcc   :  { %s5933_s21 = scalar_lea.vmem %s119_s8, 16  ;;  %s5937_s6 = scalar_lea.vmem %s119_s8, 32 }
  0xcd   :  { %p5934_p11 = scmp.ne.s32.totalorder %s119_s8, %s5933_s21  ;;  %p5938_p12 = scmp.lt.s32.totalorder %s119_s8, %s119_s8 }
  0xce   :  { %p5939_p13 = scmp.lt.s32.totalorder %s5937_s6, %s5933_s21 }
  0xd0   :  { %p5940_p0 = por %p5939_p13, %p5938_p12 }
  0xd2   :  { %p5941_p1 = pnand %p5940_p0, %p5934_p11 }
  0xd4   :  { %5944 = shalt.err (!%p5941_p1)
}
  0xd5   :  { %121 = dma.hbm_to_vmem [thread:$0]  %s7374_s9, 16, %s119_s8, [#allocation11]  }
  0xd6   :  { %s5945_s2 = scalar_lea.hbm %s7327_s16, 16 }
  0xd7   :  { %p5946_p2 = scmp.ne.s32.totalorder %s7327_s16, %s5945_s2  ;;  %p5949_p3 = scmp.lt.u32.totalorder %s5945_s2, %s7327_s16 }
  0xd9   :  { %p5951_p4 = pnand %p5949_p3, %p5946_p2 }
  0xdb   :  { %5954 = shalt.err (!%p5951_p4)
}
  0xdc   :  { %s5955_s1 = scalar_lea.vmem %s147_s3, 16  ;;  %s5959_s11 = scalar_lea.vmem %s147_s3, 32 }
  0xdd   :  { %p5956_p5 = scmp.ne.s32.totalorder %s147_s3, %s5955_s1  ;;  %p5960_p6 = scmp.lt.s32.totalorder %s147_s3, %s147_s3 }
  0xde   :  { %p5961_p7 = scmp.lt.s32.totalorder %s5959_s11, %s5955_s1 }
  0xe0   :  { %p5962_p8 = por %p5961_p7, %p5960_p6 }
  0xe2   :  { %p5963_p9 = pnand %p5962_p8, %p5956_p5 }
  0xe4   :  { %5966 = shalt.err (!%p5963_p9)
}
  0xe5   :  { %149 = dma.hbm_to_vmem [thread:$0]  %s7327_s16, 16, %s147_s3, [#allocation14]  }
  0xe6   :  { %s6015_s25 = smov [#allocation18]   ;;  %s5967_s21 = scalar_lea.hbm %s7333_s22, 16 }
  0xe7   :  { %s174_s4 = sshll.u32 %s6015_s25, 4  ;;  %p5968_p10 = scmp.ne.s32.totalorder %s7333_s22, %s5967_s21  ;;  %s175_s4 = int_to_ptr.vmem [resolvable:$true] %s174_s4 }
  0xe8   :  { %p5971_p11 = scmp.lt.u32.totalorder %s5967_s21, %s7333_s22 }
  0xea   :  { %p5973_p12 = pnand %p5971_p11, %p5968_p10 }
  0xec   :  { %5976 = shalt.err (!%p5973_p12)
}
  0xed   :  { %s5977_s0 = scalar_lea.vmem %s175_s4, 16  ;;  %s5981_s16 = scalar_lea.vmem %s175_s4, 32 }
  0xee   :  { %p5978_p13 = scmp.ne.s32.totalorder %s175_s4, %s5977_s0  ;;  %p5982_p0 = scmp.lt.s32.totalorder %s175_s4, %s175_s4 }
  0xef   :  { %p5983_p1 = scmp.lt.s32.totalorder %s5981_s16, %s5977_s0 }
  0xf1   :  { %p5984_p2 = por %p5983_p1, %p5982_p0 }
  0xf3   :  { %p5985_p3 = pnand %p5984_p2, %p5978_p13 }
  0xf5   :  { %5988 = shalt.err (!%p5985_p3)
}
  0xf6   :  { %177 = dma.hbm_to_vmem [thread:$0]  %s7333_s22, 16, %s175_s4, [#allocation17]  }
  0xf7   :  { %5989 = dma.done.wait [#allocation3], 2048  }
  0xf8   :  { %5990 = vsyncadd [#allocation3], 4294965248 }
  0xf9   :  { %5991 = dma.done.wait [#allocation5], 80  }
  0xfa   :  { %5992 = vsyncadd [#allocation5], 4294967216 }
  0xfb   :  { %5993 = dma.done.wait [#allocation8], 1040  }
  0xfc   :  { %5994 = vsyncadd [#allocation8], 4294966256 }
  0xfd   :  { %5995 = dma.done.wait [#allocation11], 32  }
  0xfe   :  { %5996 = vsyncadd [#allocation11], 4294967264 }
  0xff   :  { %5997 = dma.done.wait [#allocation14], 32  }
 0x100   :  { %5998 = vsyncadd [#allocation14], 4294967264 }
 0x101   :  { %5999 = dma.done.wait [#allocation17], 32  }
 0x102   :  { %6000 = vsyncadd [#allocation17], 4294967264  ;;  %v6016_v0 = vmov 0   ;;  %v5479_v1 = vld [vmem:[#allocation2 + $0x4] ss:$8 sps:$4 sm:$0xff]   ;;  %s7375_s29 = sld [smem:[#allocation25_spill]] }
 0x103   :  { %350 = vmatprep.mubr.bf16.mxu0 %v6016_v0  ;;  %v5481_v2 = vld [vmem:[#allocation2] ss:$8 sps:$4 sm:$0xff]   ;;  %318 = vmatprep.subr.bf16.mxu0 %v5479_v1  ;;  %v5482_v3 = vld [vmem:[#allocation2 + $0x14] ss:$8 sps:$4 sm:$0xff]   ;;  %v5484_v4 = vld [vmem:[#allocation2 + $0x10] ss:$8 sps:$4 sm:$0xff]  }
 0x104   :  { %319 = vmatpush1.bf16.msra.mxu0 %v5481_v2  ;;  %v5485_v5 = vld [vmem:[#allocation2 + $0x24] ss:$8 sps:$4 sm:$0xff]   ;;  %v5487_v6 = vld [vmem:[#allocation2 + $0x20] ss:$8 sps:$4 sm:$0xff]   ;;  %v5488_v7 = vld [vmem:[#allocation2 + $0x34] ss:$8 sps:$4 sm:$0xff]  }
 0x105   :  { %320 = vmatprep.subr.bf16.mxu0 %v5482_v3  ;;  %v5490_v8 = vld [vmem:[#allocation2 + $0x30] ss:$8 sps:$4 sm:$0xff]   ;;  %v5491_v9 = vld [vmem:[#allocation2 + $0x44] ss:$8 sps:$4 sm:$0xff]   ;;  %v5493_v10 = vld [vmem:[#allocation2 + $0x40] ss:$8 sps:$4 sm:$0xff]  }
 0x106   :  { %v5494_v11 = vld [vmem:[#allocation2 + $0x54] ss:$8 sps:$4 sm:$0xff]   ;;  %v5496_v12 = vld [vmem:[#allocation2 + $0x50] ss:$8 sps:$4 sm:$0xff]   ;;  %v5497_v13 = vld [vmem:[#allocation2 + $0x64] ss:$8 sps:$4 sm:$0xff]  }
 0x107   :  { %v5499_v14 = vld [vmem:[#allocation2 + $0x60] ss:$8 sps:$4 sm:$0xff]   ;;  %v5500_v15 = vld [vmem:[#allocation2 + $0x74] ss:$8 sps:$4 sm:$0xff]   ;;  %v5502_v16 = vld [vmem:[#allocation2 + $0x70] ss:$8 sps:$4 sm:$0xff]  }
 0x108   :  { %321 = vmatpush1.bf16.msra.mxu0 %v5484_v4  ;;  %v220_v17 = vld [vmem:[%s7375_s29] sm:$0xff]  ;;  %v6017_v19 = vmov 0.0   ;;  %vm6018_vm0 = vmmov 0   ;;  %s7376_s1 = sld [smem:[#allocation30_spill]]  ;;  %v6019_v23 = vmov 0.0|0.0   ;;  %vm368_vm1 = vcmask 1043456  }
 0x109   :  { %322 = vmatprep.subr.bf16.mxu0 %v5485_v5  ;;  %v221_v18 = vpack.c.bf16 %v220_v17, %v220_v17  ;;  %4666 = vmatprep.subr.bf16.mxu1 %v6017_v19  ;;  %v363_v43 = vld [vmem:[#allocation4 + $0x2] sm:$0x3]  ;;  %vm364_vm2 = vcmask 64512   ;;  %v361_v45 = vld [vmem:[#allocation4] sm:$0x3]  ;;  %v646_v17 = vld [vmem:[#allocation9 + $0x20] sm:$0xff] }
 0x10a   :  { %4668 = vmatprep.mubr.msk.bf16.mxu1 %vm6018_vm0, %v6017_v19  ;;  %s7377_s27 = sld [smem:[#allocation32_spill]]  ;;  %vm650_vm3 = vcmask 523264   ;;  %s7378_s28 = sld [smem:[#allocation36_spill]]  ;;  %vm1094_vm4 = vcmask 1041408   ;;  %vm1090_vm5 = vcmask 31744   ;;  %vm1468_vm6 = vcmask 261120  }
 0x10b   :  { %s7379_s15 = sld [smem:[#allocation33_spill]]  ;;  %vm2315_vm7 = vcmask 130048  }
 0x10c   :  { %323 = vmatpush1.bf16.msra.mxu0 %v5487_v6 }
 0x10d   :  { %324 = vmatprep.subr.bf16.mxu0 %v5488_v7 }
 0x10e   :  { %v473_v20 = vld [vmem:[%s7376_s1] sm:$0xff]  ;;  %v474_v21 = vld [vmem:[%s7376_s1 + $0x8] sm:$0xff]  ;;  %v475_v22 = vld [vmem:[%s7376_s1 + $0x10] sm:$0xff] }
 0x10f   :  { %v6324_v24 = vpack.c.bf16 %v474_v21, %v473_v20  ;;  %v476_v25 = vld [vmem:[%s7376_s1 + $0x18] sm:$0xff]  ;;  %v477_v27 = vld [vmem:[%s7376_s1 + $0x20] sm:$0xff]  ;;  %v478_v28 = vld [vmem:[%s7376_s1 + $0x28] sm:$0xff] }
 0x110   :  { %325 = vmatpush1.bf16.msra.mxu0 %v5490_v8  ;;  %v6330_v26 = vpack.c.bf16 %v476_v25, %v475_v22  ;;  %v6340_v29 = vpack.c.bf16 %v478_v28, %v477_v27  ;;  %v479_v30 = vld [vmem:[%s7376_s1 + $0x30] sm:$0xff]  ;;  %v480_v31 = vld [vmem:[%s7376_s1 + $0x38] sm:$0xff]  ;;  %v481_v33 = vld [vmem:[%s7376_s1 + $0x40] sm:$0xff] }
 0x111   :  { %326 = vmatprep.subr.bf16.mxu0 %v5491_v9  ;;  %v6350_v32 = vpack.c.bf16 %v480_v31, %v479_v30  ;;  %v482_v34 = vld [vmem:[%s7376_s1 + $0x48] sm:$0xff]  ;;  %v483_v46 = vld [vmem:[%s7376_s1 + $0x50] sm:$0xff]  ;;  %v484_v47 = vld [vmem:[%s7376_s1 + $0x58] sm:$0xff] }
 0x112   :  { %v6360_v35 = vpack.c.bf16 %v482_v34, %v481_v33  ;;  %v5178_v48 = vpack.c.bf16 %v484_v47, %v483_v46  ;;  %v485_v49 = vld [vmem:[%s7376_s1 + $0x60] sm:$0xff]  ;;  %v486_v50 = vld [vmem:[%s7376_s1 + $0x68] sm:$0xff]  ;;  %v487_v52 = vld [vmem:[%s7376_s1 + $0x70] sm:$0xff] }
 0x113   :  { %v5181_v51 = vpack.c.bf16 %v486_v50, %v485_v49  ;;  %v488_v53 = vld [vmem:[%s7376_s1 + $0x78] sm:$0xff]  ;;  %v649_v22 = vld [vmem:[#allocation9 + $0x38] sm:$0xff]  ;;  %s7380_s1 = sld [smem:[#allocation37_spill]] }
 0x114   :  { %327 = vmatpush1.bf16.msra.mxu0 %v5493_v10  ;;  %v5184_v54 = vpack.c.bf16 %v488_v53, %v487_v52  ;;  %v648_v21 = vld [vmem:[#allocation9 + $0x30] sm:$0xff]  ;;  %v5503_v25 = vld [vmem:[%s7377_s27] ss:$16 sps:$4 sm:$0xff]   ;;  %v5511_v27 = vld [vmem:[%s7377_s27 + $0x24] ss:$16 sps:$4 sm:$0xff]  }
 0x115   :  { %328 = vmatprep.subr.bf16.mxu0 %v5494_v11  ;;  %v642_v11 = vld [vmem:[#allocation9] sm:$0xff]  ;;  %v5509_v28 = vld [vmem:[%s7377_s27 + $0x20] ss:$16 sps:$4 sm:$0xff]   ;;  %v5517_v49 = vld [vmem:[%s7377_s27 + $0x44] ss:$16 sps:$4 sm:$0xff]  }
 0x116   :  { %v5514_v47 = vld [vmem:[%s7377_s27 + $0x2c] ss:$16 sps:$4 sm:$0xff]   ;;  %v5518_v52 = vld [vmem:[%s7377_s27 + $0x48] ss:$16 sps:$4 sm:$0xff]   ;;  %v5521_v53 = vld [vmem:[%s7377_s27 + $0x60] ss:$16 sps:$4 sm:$0xff]  }
 0x117   :  { %v5520_v50 = vld [vmem:[%s7377_s27 + $0x4c] ss:$16 sps:$4 sm:$0xff]  }
 0x118   :  { %329 = vmatpush1.bf16.msra.mxu0 %v5496_v12  ;;  %v643_v12 = vld [vmem:[#allocation9 + $0x8] sm:$0xff] }
 0x119   :  { %330 = vmatprep.subr.bf16.mxu0 %v5497_v13  ;;  %v5211_v13 = vpack.c.bf16 %v643_v12, %v642_v11  ;;  %v797_v11 = vlaneseq }
 0x11b   :  { %v798_v12 = vshrl.u32 %v797_v11, 7 }
 0x11c   :  { %331 = vmatpush1.bf16.msra.mxu0 %v5499_v14  ;;  %v644_v14 = vld [vmem:[#allocation9 + $0x10] sm:$0xff] }
 0x11d   :  { %332 = vmatprep.subr.bf16.mxu0 %v5500_v15  ;;  %v645_v15 = vld [vmem:[#allocation9 + $0x18] sm:$0xff] }
 0x120   :  { %333 = vmatpush1.bf16.msra.mxu0 %v5502_v16  ;;  %v5214_v16 = vpack.c.bf16 %v645_v15, %v644_v14 }
 0x121   :  { %5162 = vmatprep.subr.bf16.mxu0 %v6019_v23 }
 0x123   :  { %351 = vmatmul.mubr.bf16.vlgmr.msra.gmra.mrb[0].mxu0 %v221_v18  ;;  %v647_v18 = vld [vmem:[#allocation9 + $0x28] sm:$0xff] }
 0x124   :  { %4710 = vmatprep.mubr.msk.f32.mxu0 %vm6018_vm0, %v6017_v19  ;;  %5164 = vmatpush3.bf16.msra.mxu0 %v6324_v24  ;;  %v5217_v20 = vpack.c.bf16 %v647_v18, %v646_v17 }
 0x125   :  { %5165 = vmatprep.subr.bf16.mxu0 %v6019_v23 }
 0x128   :  { %5167 = vmatpush3.bf16.msra.mxu0 %v6330_v26 }
 0x129   :  { %5168 = vmatprep.subr.bf16.mxu0 %v6019_v23 }
 0x12c   :  { %5170 = vmatpush3.bf16.msra.mxu0 %v6340_v29 }
 0x12d   :  { %5171 = vmatprep.subr.bf16.mxu0 %v6019_v23 }
 0x130   :  { %5173 = vmatpush3.bf16.msra.mxu0 %v6350_v32 }
 0x131   :  { %5174 = vmatprep.subr.bf16.mxu0 %v6019_v23 }
 0x134   :  { %5176 = vmatpush3.bf16.msra.mxu0 %v6360_v35 }
 0x135   :  { %5177 = vmatprep.subr.bf16.mxu0 %v6019_v23 }
 0x138   :  { %5179 = vmatpush3.bf16.msra.mxu0 %v5178_v48 }
 0x139   :  { %5180 = vmatprep.subr.bf16.mxu0 %v6019_v23 }
 0x13c   :  { %5182 = vmatpush3.bf16.msra.mxu0 %v5181_v51 }
 0x13d   :  { %5183 = vmatprep.subr.bf16.mxu0 %v6019_v23 }
 0x140   :  { %5185 = vmatpush3.bf16.msra.mxu0 %v5184_v54 }
 0x141   :  { %5186 = vmatprep.subr.bf16.mxu0 %v6019_v23 }
 0x1f6   :  { %v352_v36 = vpop.f32.mrb[0].mxu0 }
 0x1f7   :  { %v354_v37 = vpop.f32.mrb[1].mxu0  ;;  %v359_v41 = vpack.c.bf16 %v352_v36, %v352_v36 }
 0x1f8   :  { %v360_v38 = vpack.c.bf16 %v354_v37, %v354_v37  ;;  %v356_v39 = vpop.f32.mrb[2].mxu0 }
 0x1f9   :  { %v357_v40 = vpop.f32.mrb[3].mxu0  ;;  %v416_v44 = vsel %vm368_vm1, %v359_v41, 0  ;;  %v637_v39 = vld [vmem:[#allocation6] sm:$0x1] }
 0x1fa   :  { %v370_v42 = vsel %vm368_vm1, %v360_v38, 0 }
 0x1fb   :  { %4667 = vmatpush3.bf16.msra.mxu1 %v370_v42 }
 0x1fc   :  { %4672 = vmatprep.subr.bf16.mxu1 %v6017_v19 }
 0x1fe   :  { %4669 = vmatmul.mubr.msk.bf16.vlgmr.msra.gmra.mrb[0].mxu1 %vm364_vm2, %v363_v43  ;;  %v5508_v43 = vld [vmem:[%s7377_s27 + $0xc] ss:$16 sps:$4 sm:$0xff]  }
 0x1ff   :  { %4673 = vmatpush3.bf16.msra.mxu1 %v416_v44  ;;  %4674 = vmatprep.mubr.msk.bf16.mxu1 %vm6018_vm0, %v6017_v19  ;;  %v639_v44 = vld [vmem:[#allocation7] sm:$0x1] }
 0x200   :  { %5210 = vmatprep.subr.bf16.mxu1 %v6019_v23 }
 0x20a   :  { %4675 = vmatmul.mubr.msk.bf16.vlgmr.msra.gmra.mrb[0].mxu1 %vm364_vm2, %v361_v45  ;;  %v5506_v45 = vld [vmem:[%s7377_s27 + $0x8] ss:$16 sps:$4 sm:$0xff]  }
 0x20b   :  { %4764 = vmatprep.mubr.msk.f32.mxu1 %vm6018_vm0, %v6017_v19  ;;  %5212 = vmatpush3.bf16.msra.mxu1 %v5211_v13 }
 0x20c   :  { %5213 = vmatprep.subr.bf16.mxu1 %v6019_v23 }
 0x20f   :  { %5215 = vmatpush3.bf16.msra.mxu1 %v5214_v16 }
 0x210   :  { %5216 = vmatprep.subr.bf16.mxu1 %v6019_v23 }
 0x213   :  { %5218 = vmatpush3.bf16.msra.mxu1 %v5217_v20 }
 0x214   :  { %5219 = vmatprep.subr.bf16.mxu1 %v6019_v23 }
 0x2dd   :  { %v6396_v55 = vpop.f32.mrb[0].mxu1 }
 0x2de   :  { %v458_v56 = vsel %vm368_vm1, %v6396_v55, 0.0  ;;  %v4676_v57 = vpop.f32.mrb[1].mxu1  ;;  %v465_v3 = vmul.f32 %v6396_v55, %v6396_v55 }
 0x2df   :  { %v459_v58 = vrot.slane %v458_v56, 4  ;;  %v455_v59 = vpop.f32.mrb[2].mxu1  ;;  %v5526_v57 = vld [vmem:[%s7377_s27 + $0x6c] ss:$16 sps:$4 sm:$0xff]  }
 0x2e0   :  { %v4677_v60 = vpop.f32.mrb[3].mxu1  ;;  %v466_v4 = vsel %vm368_vm1, %v465_v3, 0.0  ;;  %v5532_v59 = vld [vmem:[%s7377_s27 + $0x8c] ss:$16 sps:$4 sm:$0xff]   ;;  %v5541_v3 = vld [vmem:[%s7377_s27 + $0xc4] ss:$16 sps:$4 sm:$0xff]  }
 0x2e1   :  { %v460_v61 = vadd.f32 %v459_v58, %v458_v56  ;;  %v467_v5 = vrot.slane %v466_v4, 4  ;;  %v5524_v56 = vld [vmem:[%s7377_s27 + $0x68] ss:$16 sps:$4 sm:$0xff]   ;;  %v5529_v58 = vld [vmem:[%s7377_s27 + $0x84] ss:$16 sps:$4 sm:$0xff]  }
 0x2e2   :  { %v5527_v60 = vld [vmem:[%s7377_s27 + $0x80] ss:$16 sps:$4 sm:$0xff]  }
 0x2e3   :  { %v461_v62 = vrot.slane %v460_v61, 2  ;;  %v468_v6 = vadd.f32 %v467_v5, %v466_v4  ;;  %v5544_v4 = vld [vmem:[%s7377_s27 + $0xcc] ss:$16 sps:$4 sm:$0xff]   ;;  %v5539_v5 = vld [vmem:[%s7377_s27 + $0xc0] ss:$16 sps:$4 sm:$0xff]  }
 0x2e5   :  { %v462_v63 = vadd.f32 %v461_v62, %v460_v61  ;;  %v469_v7 = vrot.slane %v468_v6, 2  ;;  %v5530_v61 = vld [vmem:[%s7377_s27 + $0x88] ss:$16 sps:$4 sm:$0xff]   ;;  %v5535_v62 = vld [vmem:[%s7377_s27 + $0xa4] ss:$16 sps:$4 sm:$0xff]  }
 0x2e7   :  { %v463_v1 = vrot.slane %v462_v63, 1  ;;  %v470_v8 = vadd.f32 %v469_v7, %v468_v6  ;;  %v5542_v6 = vld [vmem:[%s7377_s27 + $0xc8] ss:$16 sps:$4 sm:$0xff]   ;;  %v5547_v7 = vld [vmem:[%s7377_s27 + $0xe4] ss:$16 sps:$4 sm:$0xff]  }
 0x2e9   :  { %v464_v2 = vadd.f32 %v463_v1, %v462_v63  ;;  %v471_v9 = vrot.slane %v470_v8, 1  ;;  %v5538_v63 = vld [vmem:[%s7377_s27 + $0xac] ss:$16 sps:$4 sm:$0xff]   ;;  %v5533_v1 = vld [vmem:[%s7377_s27 + $0xa0] ss:$16 sps:$4 sm:$0xff]  }
 0x2eb   :  { %4711 = vmatmul.mubr.f32.vlgmr.msra.gmra.mrb[4].mxu0 %v464_v2  ;;  %v472_v10 = vadd.f32 %v471_v9, %v470_v8  ;;  %v5536_v2 = vld [vmem:[%s7377_s27 + $0xa8] ss:$16 sps:$4 sm:$0xff]   ;;  %v5550_v8 = vld [vmem:[%s7377_s27 + $0xec] ss:$16 sps:$4 sm:$0xff]   ;;  %v5545_v9 = vld [vmem:[%s7377_s27 + $0xe0] ss:$16 sps:$4 sm:$0xff]  }
 0x2ec   :  { %5188 = vmatpush3.bf16.msra.mxu0 %v6324_v24  ;;  %4745 = vmatprep.mubr.msk.f32.mxu0 %vm6018_vm0, %v6017_v19  ;;  %v5220_v24 = vpack.c.bf16 %v649_v22, %v648_v21 }
 0x2ed   :  { %5189 = vmatprep.subr.bf16.mxu0 %v6019_v23 }
 0x2ee   :  { %5221 = vmatpush3.bf16.msra.mxu1 %v5220_v24 }
 0x2ef   :  { %5222 = vmatprep.subr.bf16.mxu1 %v6019_v23 }
 0x2f0   :  { %5191 = vmatpush3.bf16.msra.mxu0 %v6330_v26  ;;  %v5505_v26 = vld [vmem:[%s7377_s27 + $0x4] ss:$16 sps:$4 sm:$0xff]  }
 0x2f1   :  { %5192 = vmatprep.subr.bf16.mxu0 %v6019_v23 }
 0x2f4   :  { %5194 = vmatpush3.bf16.msra.mxu0 %v6340_v29 }
 0x2f5   :  { %5195 = vmatprep.subr.bf16.mxu0 %v6019_v23 }
 0x2f8   :  { %5197 = vmatpush3.bf16.msra.mxu0 %v6350_v32 }
 0x2f9   :  { %5198 = vmatprep.subr.bf16.mxu0 %v6019_v23 }
 0x2fc   :  { %5200 = vmatpush3.bf16.msra.mxu0 %v6360_v35 }
 0x2fd   :  { %5201 = vmatprep.subr.bf16.mxu0 %v6019_v23 }
 0x300   :  { %5203 = vmatpush3.bf16.msra.mxu0 %v5178_v48  ;;  %v5512_v48 = vld [vmem:[%s7377_s27 + $0x28] ss:$16 sps:$4 sm:$0xff]  }
 0x301   :  { %5204 = vmatprep.subr.bf16.mxu0 %v6019_v23 }
 0x304   :  { %5206 = vmatpush3.bf16.msra.mxu0 %v5181_v51  ;;  %v5515_v51 = vld [vmem:[%s7377_s27 + $0x40] ss:$16 sps:$4 sm:$0xff]  }
 0x305   :  { %5207 = vmatprep.subr.bf16.mxu0 %v6019_v23 }
 0x308   :  { %5209 = vmatpush3.bf16.msra.mxu0 %v5184_v54  ;;  %v5523_v54 = vld [vmem:[%s7377_s27 + $0x64] ss:$16 sps:$4 sm:$0xff]  }
 0x309   :  { %1001 = vmatprep.subr.bf16.mxu0 %v5505_v26  ;;  %v1295_v26 = vld [vmem:[%s7378_s28] sm:$0xff] }
 0x30b   :  { %4746 = vmatmul.mubr.f32.vlgmr.msra.gmra.mrb[6].mxu0 %v472_v10  ;;  %v5548_v10 = vld [vmem:[%s7377_s27 + $0xe8] ss:$16 sps:$4 sm:$0xff]  }
 0x30c   :  { %1033 = vmatprep.mubr.bf16.mxu0 %v6016_v0  ;;  %1002 = vmatpush1.bf16.msra.mxu0 %v5503_v25 }
 0x30d   :  { %1003 = vmatprep.subr.bf16.mxu0 %v5511_v27 }
 0x310   :  { %1004 = vmatpush1.bf16.msra.mxu0 %v5509_v28  ;;  %v1297_v28 = vld [vmem:[%s7378_s28 + $0x10] sm:$0xff] }
 0x311   :  { %1005 = vmatprep.subr.bf16.mxu0 %v5517_v49 }
 0x314   :  { %1006 = vmatpush1.bf16.msra.mxu0 %v5515_v51  ;;  %v4229_v51 = vld [vmem:[%s7379_s15 + $0x4] sm:$0xf] }
 0x315   :  { %1007 = vmatprep.subr.bf16.mxu0 %v5523_v54  ;;  %v1087_v54 = vld [vmem:[%s7379_s15] sm:$0xf] }
 0x318   :  { %1008 = vmatpush1.bf16.msra.mxu0 %v5521_v53 }
 0x319   :  { %1009 = vmatprep.subr.bf16.mxu0 %v5529_v58  ;;  %v4232_v58 = vld [vmem:[%s7379_s15 + $0x8] sm:$0xf] }
 0x31c   :  { %1010 = vmatpush1.bf16.msra.mxu0 %v5527_v60  ;;  %v4234_v60 = vld [vmem:[%s7379_s15 + $0xc] sm:$0xf]  ;;  %s7381_s15 = sld [smem:[#allocation38_spill]] }
 0x31d   :  { %1011 = vmatprep.subr.bf16.mxu0 %v5535_v62  ;;  %v1306_v62 = vld [vmem:[%s7378_s28 + $0x58] sm:$0xff] }
 0x320   :  { %1012 = vmatpush1.bf16.msra.mxu0 %v5533_v1  ;;  %v1307_v1 = vld [vmem:[%s7378_s28 + $0x60] sm:$0xff] }
 0x321   :  { %1013 = vmatprep.subr.bf16.mxu0 %v5541_v3 }
 0x324   :  { %1014 = vmatpush1.bf16.msra.mxu0 %v5539_v5  ;;  %v1310_v5 = vld [vmem:[%s7378_s28 + $0x78] sm:$0xff] }
 0x325   :  { %1015 = vmatprep.subr.bf16.mxu0 %v5547_v7 }
 0x328   :  { %1016 = vmatpush1.bf16.msra.mxu0 %v5545_v9 }
 0x329   :  { %4786 = vmatprep.subr.bf16.mxu0 %v6017_v19 }
 0x3be   :  { %v555_v29 = vpop.f32.mrb[4].mxu0 }
 0x3bf   :  { %v4712_v30 = vpop.f32.mrb[5].mxu0  ;;  %v630_v31 = vmul.f32 0.125, %v555_v29  ;;  %v1298_v29 = vld [vmem:[%s7378_s28 + $0x18] sm:$0xff] }
 0x3c0   :  { %v5238_v30 = vpack.c.bf16 %v1298_v29, %v1297_v28  ;;  %v1466_v28 = vld [vmem:[%s7323_s12 + $0x10] sm:$0xff] }
 0x3c1   :  { %v632_v33 = vmul.f32 %v630_v31, %v630_v31 }
 0x3de   :  { %v625_v32 = vpop.f32.mrb[6].mxu0 }
 0x3df   :  { %v631_v34 = vmul.f32 0.125, %v625_v32  ;;  %v4747_v35 = vpop.f32.mrb[7].mxu0  ;;  %v1300_v32 = vld [vmem:[%s7378_s28 + $0x28] sm:$0xff] }
 0x3e0   :  { %v1302_v35 = vld [vmem:[%s7378_s28 + $0x38] sm:$0xff] }
 0x3e1   :  { %v633_v36 = vsub.f32 %v631_v34, %v632_v33  ;;  %v1301_v34 = vld [vmem:[%s7378_s28 + $0x30] sm:$0xff] }
 0x3e3   :  { %v634_v37 = vmax.f32 %v633_v36, 0.0  ;;  %v5244_v36 = vpack.c.bf16 %v1302_v35, %v1301_v34  ;;  %v5562_v34 = vld [vmem:[%s7324_s13 + $0x2c] ss:$16 sps:$4 sm:$0xff]   ;;  %v5560_v35 = vld [vmem:[%s7324_s13 + $0x28] ss:$16 sps:$4 sm:$0xff]  }
 0x3e5   :  { %v635_v38 = vadd.f32 1e-05, %v634_v37  ;;  %v1303_v37 = vld [vmem:[%s7378_s28 + $0x40] sm:$0xff] }
 0x3e7   :  { %5723 = vrsqrt.f32 %v635_v38  ;;  %v1304_v38 = vld [vmem:[%s7378_s28 + $0x48] sm:$0xff] }
 0x3f1   :  { %v5724_v40 = vpop.eup %5723 }
 0x3f2   :  { %v638_v41 = vmul.f32 %v5724_v40, %v637_v39  ;;  %v5247_v39 = vpack.c.bf16 %v1304_v38, %v1303_v37  ;;  %v5566_v37 = vld [vmem:[%s7324_s13 + $0x48] ss:$16 sps:$4 sm:$0xff]   ;;  %v5574_v38 = vld [vmem:[%s7324_s13 + $0x6c] ss:$16 sps:$4 sm:$0xff]  }
 0x3f4   :  { %4765 = vmatmul.mubr.msk.f32.vlgmr.msra.gmra.mrb[4].mxu1 %vm650_vm3, %v638_v41  ;;  %v640_v42 = vmul.f32 %v638_v41, %v630_v31  ;;  %v1299_v31 = vld [vmem:[%s7378_s28 + $0x20] sm:$0xff] }
 0x3f5   :  { %5224 = vmatpush3.bf16.msra.mxu1 %v5211_v13  ;;  %4783 = vmatprep.mubr.msk.f32.mxu1 %vm6018_vm0, %v6017_v19  ;;  %v6528_v13 = vsub.s32 0, %v798_v12  ;;  %v5241_v33 = vpack.c.bf16 %v1300_v32, %v1299_v31  ;;  %v5554_v32 = vld [vmem:[%s7324_s13 + $0x8] ss:$16 sps:$4 sm:$0xff]  }
 0x3f6   :  { %5225 = vmatprep.subr.bf16.mxu1 %v6019_v23  ;;  %v641_v46 = vsub.f32 %v639_v44, %v640_v42 }
 0x3f9   :  { %5227 = vmatpush3.bf16.msra.mxu1 %v5214_v16 }
 0x3fa   :  { %5228 = vmatprep.subr.bf16.mxu1 %v6019_v23 }
 0x3fd   :  { %5230 = vmatpush3.bf16.msra.mxu1 %v5217_v20 }
 0x3fe   :  { %5231 = vmatprep.subr.bf16.mxu1 %v6019_v23 }
 0x401   :  { %5233 = vmatpush3.bf16.msra.mxu1 %v5220_v24 }
 0x402   :  { %1042 = vmatprep.subr.bf16.mxu1 %v5508_v43 }
 0x404   :  { %4784 = vmatmul.mubr.msk.f32.vlgmr.msra.gmra.mrb[6].mxu1 %vm650_vm3, %v641_v46 }
 0x405   :  { %1043 = vmatpush1.bf16.msra.mxu1 %v5506_v45  ;;  %1074 = vmatprep.mubr.bf16.mxu1 %v6016_v0 }
 0x406   :  { %1044 = vmatprep.subr.bf16.mxu1 %v5514_v47 }
 0x409   :  { %1045 = vmatpush1.bf16.msra.mxu1 %v5512_v48 }
 0x40a   :  { %1046 = vmatprep.subr.bf16.mxu1 %v5520_v50 }
 0x40d   :  { %1047 = vmatpush1.bf16.msra.mxu1 %v5518_v52 }
 0x40e   :  { %1048 = vmatprep.subr.bf16.mxu1 %v5526_v57 }
 0x411   :  { %1049 = vmatpush1.bf16.msra.mxu1 %v5524_v56 }
 0x412   :  { %1050 = vmatprep.subr.bf16.mxu1 %v5532_v59 }
 0x415   :  { %1051 = vmatpush1.bf16.msra.mxu1 %v5530_v61  ;;  %v1305_v61 = vld [vmem:[%s7378_s28 + $0x50] sm:$0xff] }
 0x416   :  { %1052 = vmatprep.subr.bf16.mxu1 %v5538_v63  ;;  %v5250_v63 = vpack.c.bf16 %v1306_v62, %v1305_v61  ;;  %v5565_v61 = vld [vmem:[%s7324_s13 + $0x44] ss:$16 sps:$4 sm:$0xff]   ;;  %v5563_v62 = vld [vmem:[%s7324_s13 + $0x40] ss:$16 sps:$4 sm:$0xff]  }
 0x419   :  { %1053 = vmatpush1.bf16.msra.mxu1 %v5536_v2  ;;  %v1308_v2 = vld [vmem:[%s7378_s28 + $0x68] sm:$0xff] }
 0x41a   :  { %1054 = vmatprep.subr.bf16.mxu1 %v5544_v4  ;;  %v5253_v3 = vpack.c.bf16 %v1308_v2, %v1307_v1  ;;  %v1309_v4 = vld [vmem:[%s7378_s28 + $0x70] sm:$0xff] }
 0x41b   :  { %v5569_v1 = vld [vmem:[%s7324_s13 + $0x60] ss:$16 sps:$4 sm:$0xff]   ;;  %v5577_v2 = vld [vmem:[%s7324_s13 + $0x84] ss:$16 sps:$4 sm:$0xff]  }
 0x41d   :  { %1055 = vmatpush1.bf16.msra.mxu1 %v5542_v6  ;;  %v5256_v6 = vpack.c.bf16 %v1310_v5, %v1309_v4  ;;  %v5575_v4 = vld [vmem:[%s7324_s13 + $0x80] ss:$16 sps:$4 sm:$0xff]   ;;  %v5578_v5 = vld [vmem:[%s7324_s13 + $0x88] ss:$16 sps:$4 sm:$0xff]  }
 0x41e   :  { %1056 = vmatprep.subr.bf16.mxu1 %v5550_v8 }
 0x421   :  { %1057 = vmatpush1.bf16.msra.mxu1 %v5548_v10 }
 0x422   :  { %5234 = vmatprep.subr.bf16.mxu1 %v6019_v23 }
 0x4c7   :  { %v720_v14 = vpop.f32.mrb[4].mxu1 }
 0x4c8   :  { %v800_v15 = vrot.slane %v720_v14, %v6528_v13  ;;  %v4766_v16 = vpop.f32.mrb[5].mxu1 }
 0x4ca   :  { %v801_v17 = vmul.f32 %v800_v15, %v6396_v55  ;;  %v1296_v55 = vld [vmem:[%s7378_s28 + $0x8] sm:$0xff] }
 0x4cb   :  { %v5235_v27 = vpack.c.bf16 %v1296_v55, %v1295_v26  ;;  %v1464_v55 = vld [vmem:[%s7323_s12] sm:$0xff] }
 0x4d7   :  { %v793_v18 = vpop.f32.mrb[6].mxu1 }
 0x4d8   :  { %v805_v20 = vrot.slane %v793_v18, %v6528_v13  ;;  %v4785_v21 = vpop.f32.mrb[7].mxu1 }
 0x4da   :  { %v806_v22 = vadd.f32 %v805_v20, %v801_v17 }
 0x4dc   :  { %v807_v24 = vmax.f32 %v806_v22, 0.0 }
 0x4de   :  { %v808_v25 = vpack.c.bf16 %v807_v24, %v807_v24 }
 0x4e0   :  { %1034 = vmatmul.mubr.bf16.vlgmr.msra.gmra.mrb[8].mxu0 %v808_v25  ;;  %1075 = vmatmul.mubr.bf16.vlgmr.msra.gmra.mrb[8].mxu1 %v808_v25 }
 0x4e1   :  { %4788 = vmatprep.mubr.msk.bf16.mxu0 %vm6018_vm0, %v6017_v19  ;;  %4842 = vmatprep.mubr.msk.f32.mxu1 %vm6018_vm0, %v6017_v19 }
 0x4e2   :  { %5236 = vmatpush3.bf16.msra.mxu1 %v5235_v27 }
 0x4e3   :  { %5237 = vmatprep.subr.bf16.mxu1 %v6019_v23 }
 0x4e6   :  { %5239 = vmatpush3.bf16.msra.mxu1 %v5238_v30 }
 0x4e7   :  { %5240 = vmatprep.subr.bf16.mxu1 %v6019_v23 }
 0x4ea   :  { %5242 = vmatpush3.bf16.msra.mxu1 %v5241_v33 }
 0x4eb   :  { %5243 = vmatprep.subr.bf16.mxu1 %v6019_v23 }
 0x4ee   :  { %5245 = vmatpush3.bf16.msra.mxu1 %v5244_v36 }
 0x4ef   :  { %5246 = vmatprep.subr.bf16.mxu1 %v6019_v23 }
 0x4f2   :  { %5248 = vmatpush3.bf16.msra.mxu1 %v5247_v39 }
 0x4f3   :  { %5249 = vmatprep.subr.bf16.mxu1 %v6019_v23 }
 0x4f6   :  { %5251 = vmatpush3.bf16.msra.mxu1 %v5250_v63 }
 0x4f7   :  { %5252 = vmatprep.subr.bf16.mxu1 %v6019_v23 }
 0x4fa   :  { %5254 = vmatpush3.bf16.msra.mxu1 %v5253_v3 }
 0x4fb   :  { %5255 = vmatprep.subr.bf16.mxu1 %v6019_v23 }
 0x4fe   :  { %5257 = vmatpush3.bf16.msra.mxu1 %v5256_v6 }
 0x4ff   :  { %5282 = vmatprep.subr.bf16.mxu1 %v6019_v23 }
 0x5b3   :  { %v1035_v40 = vpop.f32.mrb[8].mxu0  ;;  %v1076_v41 = vpop.f32.mrb[8].mxu1 }
 0x5b4   :  { %v1037_v42 = vpop.f32.mrb[9].mxu0  ;;  %v1078_v43 = vpop.f32.mrb[9].mxu1  ;;  %v1083_v49 = vpack.c.bf16 %v1035_v40, %v1035_v40  ;;  %v1085_v53 = vpack.c.bf16 %v1076_v41, %v1076_v41 }
 0x5b5   :  { %v1084_v44 = vpack.c.bf16 %v1037_v42, %v1037_v42  ;;  %v1039_v45 = vpop.f32.mrb[10].mxu0  ;;  %v1080_v46 = vpop.f32.mrb[10].mxu1  ;;  %v1086_v57 = vpack.c.bf16 %v1078_v43, %v1078_v43 }
 0x5b6   :  { %v1040_v47 = vpop.f32.mrb[11].mxu0  ;;  %v1081_v48 = vpop.f32.mrb[11].mxu1  ;;  %v1142_v52 = vsel %vm1094_vm4, %v1083_v49, 0  ;;  %v1190_v56 = vsel %vm1094_vm4, %v1085_v53, 0 }
 0x5b7   :  { %v1096_v50 = vsel %vm1094_vm4, %v1084_v44, 0  ;;  %v1239_v59 = vsel %vm1094_vm4, %v1086_v57, 0  ;;  %v5551_v57 = vld [vmem:[%s7324_s13] ss:$16 sps:$4 sm:$0xff]  }
 0x5b8   :  { %4787 = vmatpush3.bf16.msra.mxu0 %v1096_v50  ;;  %v1459_v50 = vld [vmem:[#allocation10] sm:$0x1] }
 0x5b9   :  { %4792 = vmatprep.subr.bf16.mxu0 %v6017_v19 }
 0x5bb   :  { %4789 = vmatmul.mubr.msk.bf16.vlgmr.msra.gmra.mrb[12].mxu0 %vm1090_vm5, %v4229_v51 }
 0x5bc   :  { %4793 = vmatpush3.bf16.msra.mxu0 %v1142_v52  ;;  %4794 = vmatprep.mubr.msk.bf16.mxu0 %vm6018_vm0, %v6017_v19 }
 0x5bd   :  { %4798 = vmatprep.subr.bf16.mxu0 %v6017_v19 }
 0x5c7   :  { %4795 = vmatmul.mubr.msk.bf16.vlgmr.msra.gmra.mrb[12].mxu0 %vm1090_vm5, %v1087_v54  ;;  %v5553_v54 = vld [vmem:[%s7324_s13 + $0x4] ss:$16 sps:$4 sm:$0xff]  }
 0x5c8   :  { %4799 = vmatpush3.bf16.msra.mxu0 %v1190_v56  ;;  %4800 = vmatprep.mubr.msk.bf16.mxu0 %vm6018_vm0, %v6017_v19  ;;  %v1461_v56 = vld [vmem:[#allocation12] sm:$0x1] }
 0x5c9   :  { %4804 = vmatprep.subr.bf16.mxu0 %v6017_v19 }
 0x5d3   :  { %4801 = vmatmul.mubr.msk.bf16.vlgmr.msra.gmra.mrb[12].mxu0 %vm1090_vm5, %v4232_v58 }
 0x5d4   :  { %4805 = vmatpush3.bf16.msra.mxu0 %v1239_v59  ;;  %4806 = vmatprep.mubr.msk.bf16.mxu0 %vm6018_vm0, %v6017_v19  ;;  %v5559_v59 = vld [vmem:[%s7324_s13 + $0x24] ss:$16 sps:$4 sm:$0xff]  }
 0x5d5   :  { %5258 = vmatprep.subr.bf16.mxu0 %v6019_v23 }
 0x5df   :  { %4807 = vmatmul.mubr.msk.bf16.vlgmr.msra.gmra.mrb[12].mxu0 %vm1090_vm5, %v4234_v60  ;;  %v5557_v60 = vld [vmem:[%s7324_s13 + $0x20] ss:$16 sps:$4 sm:$0xff]  }
 0x5e0   :  { %5260 = vmatpush3.bf16.msra.mxu0 %v5235_v27  ;;  %4877 = vmatprep.mubr.msk.f32.mxu0 %vm6018_vm0, %v6017_v19  ;;  %v1465_v27 = vld [vmem:[%s7323_s12 + $0x8] sm:$0xff] }
 0x5e1   :  { %5261 = vmatprep.subr.bf16.mxu0 %v6019_v23  ;;  %v5283_v29 = vpack.c.bf16 %v1465_v27, %v1464_v55 }
 0x5e4   :  { %5263 = vmatpush3.bf16.msra.mxu0 %v5238_v30  ;;  %v1467_v30 = vld [vmem:[%s7323_s12 + $0x18] sm:$0xff] }
 0x5e5   :  { %5264 = vmatprep.subr.bf16.mxu0 %v6019_v23  ;;  %v5286_v31 = vpack.c.bf16 %v1467_v30, %v1466_v28 }
 0x5e8   :  { %5266 = vmatpush3.bf16.msra.mxu0 %v5241_v33  ;;  %v5556_v33 = vld [vmem:[%s7324_s13 + $0xc] ss:$16 sps:$4 sm:$0xff]  }
 0x5e9   :  { %5267 = vmatprep.subr.bf16.mxu0 %v6019_v23 }
 0x5ec   :  { %5269 = vmatpush3.bf16.msra.mxu0 %v5244_v36  ;;  %v5568_v36 = vld [vmem:[%s7324_s13 + $0x4c] ss:$16 sps:$4 sm:$0xff]  }
 0x5ed   :  { %5270 = vmatprep.subr.bf16.mxu0 %v6019_v23 }
 0x5f0   :  { %5272 = vmatpush3.bf16.msra.mxu0 %v5247_v39  ;;  %v5572_v39 = vld [vmem:[%s7324_s13 + $0x68] ss:$16 sps:$4 sm:$0xff]  }
 0x5f1   :  { %5273 = vmatprep.subr.bf16.mxu0 %v6019_v23 }
 0x5f4   :  { %5275 = vmatpush3.bf16.msra.mxu0 %v5250_v63  ;;  %v5571_v63 = vld [vmem:[%s7324_s13 + $0x64] ss:$16 sps:$4 sm:$0xff]  }
 0x5f5   :  { %5276 = vmatprep.subr.bf16.mxu0 %v6019_v23 }
 0x5f8   :  { %5278 = vmatpush3.bf16.msra.mxu0 %v5253_v3  ;;  %v5580_v3 = vld [vmem:[%s7324_s13 + $0x8c] ss:$16 sps:$4 sm:$0xff]  }
 0x5f9   :  { %5279 = vmatprep.subr.bf16.mxu0 %v6019_v23 }
 0x5fc   :  { %5281 = vmatpush3.bf16.msra.mxu0 %v5256_v6  ;;  %v5581_v6 = vld [vmem:[%s7324_s13 + $0xa0] ss:$16 sps:$4 sm:$0xff]  }
 0x5fd   :  { %1860 = vmatprep.subr.bf16.mxu0 %v5556_v33  ;;  %v2146_v33 = vld [vmem:[%s7328_s17 + $0x10] sm:$0xff] }
 0x6b2   :  { %v6632_v7 = vpop.f32.mrb[12].mxu0 }
 0x6b3   :  { %v1282_v8 = vrot.slane %v6632_v7, 4  ;;  %v1288_v9 = vmul.f32 %v6632_v7, %v6632_v7  ;;  %v4808_v10 = vpop.f32.mrb[13].mxu0 }
 0x6b4   :  { %v1278_v11 = vpop.f32.mrb[14].mxu0  ;;  %v5586_v10 = vld [vmem:[%s7324_s13 + $0xac] ss:$16 sps:$4 sm:$0xff]  }
 0x6b5   :  { %v1283_v12 = vadd.f32 %v1282_v8, %v6632_v7  ;;  %v1289_v14 = vrot.slane %v1288_v9, 4  ;;  %v4809_v15 = vpop.f32.mrb[15].mxu0  ;;  %v5583_v8 = vld [vmem:[%s7324_s13 + $0xa4] ss:$16 sps:$4 sm:$0xff]  }
 0x6b6   :  { %v5589_v11 = vld [vmem:[%s7324_s13 + $0xc4] ss:$16 sps:$4 sm:$0xff]   ;;  %v5590_v15 = vld [vmem:[%s7324_s13 + $0xc8] ss:$16 sps:$4 sm:$0xff]  }
 0x6b7   :  { %v1284_v16 = vrot.slane %v1283_v12, 2  ;;  %v1290_v17 = vadd.f32 %v1289_v14, %v1288_v9  ;;  %v5584_v9 = vld [vmem:[%s7324_s13 + $0xa8] ss:$16 sps:$4 sm:$0xff]   ;;  %v5587_v14 = vld [vmem:[%s7324_s13 + $0xc0] ss:$16 sps:$4 sm:$0xff]  }
 0x6b9   :  { %v1285_v18 = vadd.f32 %v1284_v16, %v1283_v12  ;;  %v1291_v20 = vrot.slane %v1290_v17, 2  ;;  %v5592_v12 = vld [vmem:[%s7324_s13 + $0xcc] ss:$16 sps:$4 sm:$0xff]   ;;  %v5595_v16 = vld [vmem:[%s7324_s13 + $0xe4] ss:$16 sps:$4 sm:$0xff]  }
 0x6bb   :  { %v1286_v21 = vrot.slane %v1285_v18, 1  ;;  %v1292_v22 = vadd.f32 %v1291_v20, %v1290_v17  ;;  %v5598_v17 = vld [vmem:[%s7324_s13 + $0xec] ss:$16 sps:$4 sm:$0xff]   ;;  %v5596_v20 = vld [vmem:[%s7324_s13 + $0xe8] ss:$16 sps:$4 sm:$0xff]  }
 0x6bd   :  { %v1287_v24 = vadd.f32 %v1286_v21, %v1285_v18  ;;  %v1293_v25 = vrot.slane %v1292_v22, 1  ;;  %v5593_v18 = vld [vmem:[%s7324_s13 + $0xe0] ss:$16 sps:$4 sm:$0xff]  }
 0x6bf   :  { %4843 = vmatmul.mubr.f32.vlgmr.msra.gmra.mrb[12].mxu1 %v1287_v24  ;;  %v1294_v26 = vadd.f32 %v1293_v25, %v1292_v22 }
 0x6c0   :  { %4888 = vmatprep.mubr.msk.f32.mxu1 %vm6018_vm0, %v6017_v19  ;;  %5284 = vmatpush3.bf16.msra.mxu1 %v5283_v29 }
 0x6c1   :  { %4878 = vmatmul.mubr.f32.vlgmr.msra.gmra.mrb[16].mxu0 %v1294_v26  ;;  %5285 = vmatprep.subr.bf16.mxu1 %v6019_v23 }
 0x6c2   :  { %1892 = vmatprep.mubr.bf16.mxu0 %v6016_v0  ;;  %1861 = vmatpush1.bf16.msra.mxu0 %v5554_v32 }
 0x6c3   :  { %1862 = vmatprep.subr.bf16.mxu0 %v5562_v34  ;;  %v2147_v34 = vld [vmem:[%s7328_s17 + $0x18] sm:$0xff] }
 0x6c4   :  { %5287 = vmatpush3.bf16.msra.mxu1 %v5286_v31 }
 0x6c5   :  { %5288 = vmatprep.subr.bf16.mxu1 %v6019_v23 }
 0x6c6   :  { %1863 = vmatpush1.bf16.msra.mxu0 %v5560_v35  ;;  %v5298_v35 = vpack.c.bf16 %v2147_v34, %v2146_v33  ;;  %v2313_v34 = vld [vmem:[%s7329_s18] sm:$0xff] }
 0x6c7   :  { %1864 = vmatprep.subr.bf16.mxu0 %v5568_v36  ;;  %v2148_v36 = vld [vmem:[%s7328_s17 + $0x20] sm:$0xff] }
 0x6ca   :  { %1865 = vmatpush1.bf16.msra.mxu0 %v5566_v37  ;;  %v2149_v37 = vld [vmem:[%s7328_s17 + $0x28] sm:$0xff] }
 0x6cb   :  { %1866 = vmatprep.subr.bf16.mxu0 %v5574_v38  ;;  %v5301_v38 = vpack.c.bf16 %v2149_v37, %v2148_v36  ;;  %v5606_v37 = vld [vmem:[%s7330_s19 + $0x8] ss:$16 sps:$4 sm:$0xff]  }
 0x6ce   :  { %1867 = vmatpush1.bf16.msra.mxu0 %v5572_v39  ;;  %v2150_v39 = vld [vmem:[%s7328_s17 + $0x30] sm:$0xff] }
 0x6cf   :  { %1868 = vmatprep.subr.bf16.mxu0 %v5580_v3  ;;  %v2154_v3 = vld [vmem:[%s7328_s17 + $0x50] sm:$0xff] }
 0x6d2   :  { %1869 = vmatpush1.bf16.msra.mxu0 %v5578_v5 }
 0x6d3   :  { %1870 = vmatprep.subr.bf16.mxu0 %v5586_v10  ;;  %v2158_v10 = vld [vmem:[%s7328_s17 + $0x70] sm:$0xff] }
 0x6d6   :  { %1871 = vmatpush1.bf16.msra.mxu0 %v5584_v9 }
 0x6d7   :  { %1872 = vmatprep.subr.bf16.mxu0 %v5592_v12 }
 0x6da   :  { %1873 = vmatpush1.bf16.msra.mxu0 %v5590_v15 }
 0x6db   :  { %1874 = vmatprep.subr.bf16.mxu0 %v5598_v17 }
 0x6de   :  { %1875 = vmatpush1.bf16.msra.mxu0 %v5596_v20 }
 0x6df   :  { %5294 = vmatprep.subr.bf16.mxu0 %v6019_v23 }
 0x792   :  { %v1377_v40 = vpop.f32.mrb[12].mxu1 }
 0x793   :  { %v1452_v41 = vmul.f32 0.03125, %v1377_v40  ;;  %v4844_v42 = vpop.f32.mrb[13].mxu1  ;;  %v2151_v40 = vld [vmem:[%s7328_s17 + $0x38] sm:$0xff] }
 0x794   :  { %v1447_v43 = vpop.f32.mrb[16].mxu0 }
 0x795   :  { %v1454_v44 = vmul.f32 %v1452_v41, %v1452_v41  ;;  %v1453_v45 = vmul.f32 0.03125, %v1447_v43  ;;  %v4879_v46 = vpop.f32.mrb[17].mxu0 }
 0x797   :  { %v1455_v47 = vsub.f32 %v1453_v45, %v1454_v44 }
 0x799   :  { %v1456_v48 = vmax.f32 %v1455_v47, 0.0 }
 0x79b   :  { %v1457_v49 = vadd.f32 1e-05, %v1456_v48 }
 0x79d   :  { %5725 = vrsqrt.f32 %v1457_v49 }
 0x7a7   :  { %v5726_v51 = vpop.eup %5725 }
 0x7a8   :  { %v1460_v52 = vmul.f32 %v5726_v51, %v1459_v50 }
 0x7aa   :  { %4889 = vmatmul.mubr.msk.f32.vlgmr.msra.gmra.mrb[14].mxu1 %vm1468_vm6, %v1460_v52  ;;  %v1462_v53 = vmul.f32 %v1460_v52, %v1452_v41  ;;  %v5304_v41 = vpack.c.bf16 %v2151_v40, %v2150_v39  ;;  %v5614_v39 = vld [vmem:[%s7330_s19 + $0x2c] ss:$16 sps:$4 sm:$0xff]   ;;  %v5612_v40 = vld [vmem:[%s7330_s19 + $0x28] ss:$16 sps:$4 sm:$0xff]  }
 0x7ab   :  { %5290 = vmatpush3.bf16.msra.mxu1 %v5283_v29  ;;  %4899 = vmatprep.mubr.msk.f32.mxu1 %vm6018_vm0, %v6017_v19 }
 0x7ac   :  { %5291 = vmatprep.subr.bf16.mxu1 %v6019_v23  ;;  %v1463_v58 = vsub.f32 %v1461_v56, %v1462_v53  ;;  %v5599_v53 = vld [vmem:[%s7325_s14 + $0x8] sm:$0xff]  }
 0x7af   :  { %5293 = vmatpush3.bf16.msra.mxu1 %v5286_v31  ;;  %v2144_v31 = vld [vmem:[%s7328_s17] sm:$0xff] }
 0x7b0   :  { %1819 = vmatprep.subr.bf16.mxu1 %v5553_v54 }
 0x7b2   :  { %4900 = vmatmul.mubr.msk.f32.vlgmr.msra.gmra.mrb[16].mxu1 %vm1468_vm6, %v1463_v58 }
 0x7b3   :  { %1820 = vmatpush1.bf16.msra.mxu1 %v5551_v57  ;;  %1851 = vmatprep.mubr.bf16.mxu1 %v6016_v0  ;;  %v5600_v57 = vld [vmem:[%s7325_s14] sm:$0xff]  }
 0x7b4   :  { %1821 = vmatprep.subr.bf16.mxu1 %v5559_v59 }
 0x7b7   :  { %1822 = vmatpush1.bf16.msra.mxu1 %v5557_v60  ;;  %v5601_v60 = vld [vmem:[%s7325_s14 + $0x10] sm:$0xff]  }
 0x7b8   :  { %1823 = vmatprep.subr.bf16.mxu1 %v5565_v61 }
 0x7bb   :  { %1824 = vmatpush1.bf16.msra.mxu1 %v5563_v62  ;;  %v5602_v62 = vld [vmem:[%s7325_s14 + $0x18] sm:$0xff]  }
 0x7bc   :  { %1825 = vmatprep.subr.bf16.mxu1 %v5571_v63  ;;  %v2152_v63 = vld [vmem:[%s7328_s17 + $0x40] sm:$0xff] }
 0x7bf   :  { %1826 = vmatpush1.bf16.msra.mxu1 %v5569_v1  ;;  %v2153_v1 = vld [vmem:[%s7328_s17 + $0x48] sm:$0xff] }
 0x7c0   :  { %1827 = vmatprep.subr.bf16.mxu1 %v5577_v2  ;;  %v5307_v2 = vpack.c.bf16 %v2153_v1, %v2152_v63  ;;  %v5603_v1 = vld [vmem:[%s7330_s19] ss:$16 sps:$4 sm:$0xff]  }
 0x7c3   :  { %1828 = vmatpush1.bf16.msra.mxu1 %v5575_v4  ;;  %v2155_v4 = vld [vmem:[%s7328_s17 + $0x58] sm:$0xff] }
 0x7c4   :  { %1829 = vmatprep.subr.bf16.mxu1 %v5583_v8  ;;  %v5310_v5 = vpack.c.bf16 %v2155_v4, %v2154_v3  ;;  %v2157_v8 = vld [vmem:[%s7328_s17 + $0x68] sm:$0xff]  ;;  %v5611_v3 = vld [vmem:[%s7330_s19 + $0x24] ss:$16 sps:$4 sm:$0xff]   ;;  %v5609_v4 = vld [vmem:[%s7330_s19 + $0x20] ss:$16 sps:$4 sm:$0xff]  }
 0x7c7   :  { %1830 = vmatpush1.bf16.msra.mxu1 %v5581_v6  ;;  %v2156_v6 = vld [vmem:[%s7328_s17 + $0x60] sm:$0xff] }
 0x7c8   :  { %1831 = vmatprep.subr.bf16.mxu1 %v5589_v11  ;;  %v5313_v9 = vpack.c.bf16 %v2157_v8, %v2156_v6  ;;  %v2159_v11 = vld [vmem:[%s7328_s17 + $0x78] sm:$0xff]  ;;  %v5615_v6 = vld [vmem:[%s7330_s19 + $0x40] ss:$16 sps:$4 sm:$0xff]   ;;  %v5623_v8 = vld [vmem:[%s7330_s19 + $0x64] ss:$16 sps:$4 sm:$0xff]  }
 0x7c9   :  { %v5316_v12 = vpack.c.bf16 %v2159_v11, %v2158_v10  ;;  %v5629_v10 = vld [vmem:[%s7330_s19 + $0x84] ss:$16 sps:$4 sm:$0xff]   ;;  %v5627_v11 = vld [vmem:[%s7330_s19 + $0x80] ss:$16 sps:$4 sm:$0xff]  }
 0x7cb   :  { %1832 = vmatpush1.bf16.msra.mxu1 %v5587_v14 }
 0x7cc   :  { %1833 = vmatprep.subr.bf16.mxu1 %v5595_v16 }
 0x7cf   :  { %1834 = vmatpush1.bf16.msra.mxu1 %v5593_v18 }
 0x7d0   :  { %4902 = vmatprep.subr.bf16.mxu1 %v6017_v19 }
 0x87d   :  { %v1538_v21 = vpop.f32.mrb[14].mxu1 }
 0x87e   :  { %v1618_v22 = vrot.slane %v1538_v21, %v6528_v13  ;;  %v4890_v24 = vpop.f32.mrb[15].mxu1 }
 0x880   :  { %v1619_v25 = vmul.f32 %v1618_v22, %v6632_v7  ;;  %v2145_v7 = vld [vmem:[%s7328_s17 + $0x8] sm:$0xff] }
 0x881   :  { %v5295_v32 = vpack.c.bf16 %v2145_v7, %v2144_v31 }
 0x885   :  { %v1611_v26 = vpop.f32.mrb[16].mxu1 }
 0x886   :  { %v1623_v55 = vrot.slane %v1611_v26, %v6528_v13  ;;  %v4901_v27 = vpop.f32.mrb[17].mxu1 }
 0x888   :  { %v1624_v28 = vadd.f32 %v1623_v55, %v1619_v25 }
 0x88a   :  { %v1625_v29 = vmax.f32 %v1624_v28, 0.0 }
 0x88c   :  { %v1626_v30 = vpack.c.bf16 %v1625_v29, %v1625_v29 }
 0x88e   :  { %1852 = vmatmul.mubr.bf16.vlgmr.msra.gmra.mrb[20].mxu1 %v1626_v30  ;;  %1893 = vmatmul.mubr.bf16.vlgmr.msra.gmra.mrb[20].mxu0 %v1626_v30 }
 0x88f   :  { %4904 = vmatprep.mubr.msk.bf16.mxu1 %vm6018_vm0, %v6017_v19  ;;  %4958 = vmatprep.mubr.msk.f32.mxu0 %vm6018_vm0, %v6017_v19 }
 0x890   :  { %5296 = vmatpush3.bf16.msra.mxu0 %v5295_v32 }
 0x891   :  { %5297 = vmatprep.subr.bf16.mxu0 %v6019_v23 }
 0x894   :  { %5299 = vmatpush3.bf16.msra.mxu0 %v5298_v35 }
 0x895   :  { %5300 = vmatprep.subr.bf16.mxu0 %v6019_v23 }
 0x898   :  { %5302 = vmatpush3.bf16.msra.mxu0 %v5301_v38 }
 0x899   :  { %5303 = vmatprep.subr.bf16.mxu0 %v6019_v23 }
 0x89c   :  { %5305 = vmatpush3.bf16.msra.mxu0 %v5304_v41 }
 0x89d   :  { %5306 = vmatprep.subr.bf16.mxu0 %v6019_v23 }
 0x8a0   :  { %5308 = vmatpush3.bf16.msra.mxu0 %v5307_v2 }
 0x8a1   :  { %5309 = vmatprep.subr.bf16.mxu0 %v6019_v23 }
 0x8a4   :  { %5311 = vmatpush3.bf16.msra.mxu0 %v5310_v5 }
 0x8a5   :  { %5312 = vmatprep.subr.bf16.mxu0 %v6019_v23 }
 0x8a8   :  { %5314 = vmatpush3.bf16.msra.mxu0 %v5313_v9 }
 0x8a9   :  { %5315 = vmatprep.subr.bf16.mxu0 %v6019_v23 }
 0x8ac   :  { %5317 = vmatpush3.bf16.msra.mxu0 %v5316_v12 }
 0x8ad   :  { %5342 = vmatprep.subr.bf16.mxu0 %v6019_v23 }
 0x961   :  { %v1853_v42 = vpop.f32.mrb[20].mxu1  ;;  %v1894_v43 = vpop.f32.mrb[20].mxu0 }
 0x962   :  { %v1855_v44 = vpop.f32.mrb[21].mxu1  ;;  %v1896_v45 = vpop.f32.mrb[21].mxu0  ;;  %v1901_v51 = vpack.c.bf16 %v1853_v42, %v1853_v42  ;;  %v1903_v56 = vpack.c.bf16 %v1894_v43, %v1894_v43  ;;  %v5618_v42 = vld [vmem:[%s7330_s19 + $0x48] ss:$16 sps:$4 sm:$0xff]   ;;  %v5626_v43 = vld [vmem:[%s7330_s19 + $0x6c] ss:$16 sps:$4 sm:$0xff]  }
 0x963   :  { %v1902_v46 = vpack.c.bf16 %v1855_v44, %v1855_v44  ;;  %v1857_v47 = vpop.f32.mrb[22].mxu1  ;;  %v1898_v48 = vpop.f32.mrb[22].mxu0  ;;  %v1904_v59 = vpack.c.bf16 %v1896_v45, %v1896_v45  ;;  %v5624_v44 = vld [vmem:[%s7330_s19 + $0x68] ss:$16 sps:$4 sm:$0xff]   ;;  %v5632_v45 = vld [vmem:[%s7330_s19 + $0x8c] ss:$16 sps:$4 sm:$0xff]  }
 0x964   :  { %v1858_v49 = vpop.f32.mrb[23].mxu1  ;;  %v1899_v50 = vpop.f32.mrb[23].mxu0  ;;  %v1971_v54 = vsel %vm368_vm1, %v1901_v51, 0  ;;  %v2026_v58 = vsel %vm368_vm1, %v1903_v56, 0 }
 0x965   :  { %v1919_v52 = vsel %vm368_vm1, %v1902_v46, 0  ;;  %v2083_v61 = vsel %vm368_vm1, %v1904_v59, 0  ;;  %v5630_v46 = vld [vmem:[%s7330_s19 + $0x88] ss:$16 sps:$4 sm:$0xff]  }
 0x966   :  { %4903 = vmatpush3.bf16.msra.mxu1 %v1919_v52 }
 0x967   :  { %4908 = vmatprep.subr.bf16.mxu1 %v6017_v19 }
 0x969   :  { %4905 = vmatmul.mubr.msk.bf16.vlgmr.msra.gmra.mrb[24].mxu1 %vm364_vm2, %v5599_v53 }
 0x96a   :  { %4909 = vmatpush3.bf16.msra.mxu1 %v1971_v54  ;;  %4910 = vmatprep.mubr.msk.bf16.mxu1 %vm6018_vm0, %v6017_v19 }
 0x96b   :  { %4914 = vmatprep.subr.bf16.mxu1 %v6017_v19 }
 0x975   :  { %4911 = vmatmul.mubr.msk.bf16.vlgmr.msra.gmra.mrb[24].mxu1 %vm364_vm2, %v5600_v57 }
 0x976   :  { %4915 = vmatpush3.bf16.msra.mxu1 %v2026_v58  ;;  %4916 = vmatprep.mubr.msk.bf16.mxu1 %vm6018_vm0, %v6017_v19  ;;  %v2308_v58 = vld [vmem:[#allocation13] sm:$0x1] }
 0x977   :  { %4920 = vmatprep.subr.bf16.mxu1 %v6017_v19 }
 0x981   :  { %4917 = vmatmul.mubr.msk.bf16.vlgmr.msra.gmra.mrb[24].mxu1 %vm364_vm2, %v5601_v60 }
 0x982   :  { %4921 = vmatpush3.bf16.msra.mxu1 %v2083_v61  ;;  %4922 = vmatprep.mubr.msk.bf16.mxu1 %vm6018_vm0, %v6017_v19  ;;  %v5605_v61 = vld [vmem:[%s7330_s19 + $0x4] ss:$16 sps:$4 sm:$0xff]  }
 0x983   :  { %5318 = vmatprep.subr.bf16.mxu1 %v6019_v23 }
 0x98d   :  { %4923 = vmatmul.mubr.msk.bf16.vlgmr.msra.gmra.mrb[24].mxu1 %vm364_vm2, %v5602_v62  ;;  %v2310_v62 = vld [vmem:[#allocation15] sm:$0x1] }
 0x98e   :  { %5320 = vmatpush3.bf16.msra.mxu1 %v5295_v32  ;;  %4993 = vmatprep.mubr.msk.f32.mxu1 %vm6018_vm0, %v6017_v19 }
 0x98f   :  { %5321 = vmatprep.subr.bf16.mxu1 %v6019_v23 }
 0x992   :  { %5323 = vmatpush3.bf16.msra.mxu1 %v5298_v35  ;;  %v2314_v35 = vld [vmem:[%s7329_s18 + $0x8] sm:$0xff] }
 0x993   :  { %5324 = vmatprep.subr.bf16.mxu1 %v6019_v23  ;;  %v5343_v36 = vpack.c.bf16 %v2314_v35, %v2313_v34 }
 0x996   :  { %5326 = vmatpush3.bf16.msra.mxu1 %v5301_v38  ;;  %v5608_v38 = vld [vmem:[%s7330_s19 + $0xc] ss:$16 sps:$4 sm:$0xff]  }
 0x997   :  { %5327 = vmatprep.subr.bf16.mxu1 %v6019_v23 }
 0x99a   :  { %5329 = vmatpush3.bf16.msra.mxu1 %v5304_v41  ;;  %v5620_v41 = vld [vmem:[%s7330_s19 + $0x4c] ss:$16 sps:$4 sm:$0xff]  }
 0x99b   :  { %5330 = vmatprep.subr.bf16.mxu1 %v6019_v23 }
 0x99e   :  { %5332 = vmatpush3.bf16.msra.mxu1 %v5307_v2 }
 0x99f   :  { %5333 = vmatprep.subr.bf16.mxu1 %v6019_v23 }
 0x9a2   :  { %5335 = vmatpush3.bf16.msra.mxu1 %v5310_v5  ;;  %v5617_v5 = vld [vmem:[%s7330_s19 + $0x44] ss:$16 sps:$4 sm:$0xff]  }
 0x9a3   :  { %5336 = vmatprep.subr.bf16.mxu1 %v6019_v23 }
 0x9a6   :  { %5338 = vmatpush3.bf16.msra.mxu1 %v5313_v9  ;;  %v5621_v9 = vld [vmem:[%s7330_s19 + $0x60] ss:$16 sps:$4 sm:$0xff]  }
 0x9a7   :  { %5339 = vmatprep.subr.bf16.mxu1 %v6019_v23 }
 0x9aa   :  { %5341 = vmatpush3.bf16.msra.mxu1 %v5316_v12  ;;  %v5635_v12 = vld [vmem:[%s7330_s19 + $0xa4] ss:$16 sps:$4 sm:$0xff]  }
 0x9ab   :  { %2712 = vmatprep.subr.bf16.mxu1 %v5608_v38 }
 0xa60   :  { %v6861_v14 = vpop.f32.mrb[24].mxu1 }
 0xa61   :  { %v4924_v15 = vpop.f32.mrb[25].mxu1  ;;  %v2135_v17 = vmul.f32 %v6861_v14, %v6861_v14 }
 0xa62   :  { %v6863_v16 = vpop.f32.mrb[26].mxu1  ;;  %v5638_v15 = vld [vmem:[%s7330_s19 + $0xac] ss:$16 sps:$4 sm:$0xff]  }
 0xa63   :  { %v2128_v18 = vadd.f32 %v6863_v16, %v6861_v14  ;;  %v2136_v20 = vmul.f32 %v6863_v16, %v6863_v16  ;;  %v4925_v21 = vpop.f32.mrb[27].mxu1 }
 0xa64   :  { %v5644_v21 = vld [vmem:[%s7330_s19 + $0xcc] ss:$16 sps:$4 sm:$0xff]  }
 0xa65   :  { %v2129_v22 = vrot.slane %v2128_v18, 4  ;;  %v2137_v24 = vadd.f32 %v2136_v20, %v2135_v17  ;;  %v5633_v17 = vld [vmem:[%s7330_s19 + $0xa0] ss:$16 sps:$4 sm:$0xff]   ;;  %v5641_v20 = vld [vmem:[%s7330_s19 + $0xc4] ss:$16 sps:$4 sm:$0xff]  }
 0xa67   :  { %v2130_v25 = vadd.f32 %v2129_v22, %v2128_v18  ;;  %v2138_v26 = vrot.slane %v2137_v24, 4  ;;  %v5636_v18 = vld [vmem:[%s7330_s19 + $0xa8] ss:$16 sps:$4 sm:$0xff]   ;;  %v5639_v22 = vld [vmem:[%s7330_s19 + $0xc0] ss:$16 sps:$4 sm:$0xff]  }
 0xa69   :  { %v2131_v55 = vrot.slane %v2130_v25, 2  ;;  %v2139_v27 = vadd.f32 %v2138_v26, %v2137_v24  ;;  %v5642_v24 = vld [vmem:[%s7330_s19 + $0xc8] ss:$16 sps:$4 sm:$0xff]   ;;  %v5650_v26 = vld [vmem:[%s7330_s19 + $0xec] ss:$16 sps:$4 sm:$0xff]  }
 0xa6b   :  { %v2132_v28 = vadd.f32 %v2131_v55, %v2130_v25  ;;  %v2140_v29 = vrot.slane %v2139_v27, 2  ;;  %v5647_v25 = vld [vmem:[%s7330_s19 + $0xe4] ss:$16 sps:$4 sm:$0xff]   ;;  %v5645_v55 = vld [vmem:[%s7330_s19 + $0xe0] ss:$16 sps:$4 sm:$0xff]  }
 0xa6d   :  { %v2133_v30 = vrot.slane %v2132_v28, 1  ;;  %v2141_v31 = vadd.f32 %v2140_v29, %v2139_v27  ;;  %v5648_v27 = vld [vmem:[%s7330_s19 + $0xe8] ss:$16 sps:$4 sm:$0xff]   ;;  %s7382_s19 = sld [smem:[#allocation39_spill]] }
 0xa6f   :  { %v2134_v7 = vadd.f32 %v2133_v30, %v2132_v28  ;;  %v2142_v32 = vrot.slane %v2141_v31, 1 }
 0xa71   :  { %4959 = vmatmul.mubr.f32.vlgmr.msra.gmra.mrb[18].mxu0 %v2134_v7  ;;  %v2143_v33 = vadd.f32 %v2142_v32, %v2141_v31 }
 0xa72   :  { %5000 = vmatprep.mubr.msk.f32.mxu0 %vm6018_vm0, %v6017_v19  ;;  %5344 = vmatpush3.bf16.msra.mxu0 %v5343_v36 }
 0xa73   :  { %4994 = vmatmul.mubr.f32.vlgmr.msra.gmra.mrb[18].mxu1 %v2143_v33  ;;  %5345 = vmatprep.subr.bf16.mxu0 %v6019_v23 }
 0xa74   :  { %2744 = vmatprep.mubr.bf16.mxu1 %v6016_v0  ;;  %2713 = vmatpush1.bf16.msra.mxu1 %v5606_v37 }
 0xa75   :  { %2714 = vmatprep.subr.bf16.mxu1 %v5614_v39 }
 0xa78   :  { %2715 = vmatpush1.bf16.msra.mxu1 %v5612_v40  ;;  %v3069_v40 = vld [vmem:[%s7334_s23 + $0x8] sm:$0xff] }
 0xa79   :  { %2716 = vmatprep.subr.bf16.mxu1 %v5620_v41 }
 0xa7c   :  { %2717 = vmatpush1.bf16.msra.mxu1 %v5618_v42  ;;  %v3070_v42 = vld [vmem:[%s7334_s23 + $0x10] sm:$0xff] }
 0xa7d   :  { %2718 = vmatprep.subr.bf16.mxu1 %v5626_v43  ;;  %v3071_v43 = vld [vmem:[%s7334_s23 + $0x18] sm:$0xff] }
 0xa80   :  { %2719 = vmatpush1.bf16.msra.mxu1 %v5624_v44  ;;  %v5352_v44 = vpack.c.bf16 %v3071_v43, %v3070_v42 }
 0xa81   :  { %2720 = vmatprep.subr.bf16.mxu1 %v5632_v45  ;;  %v3072_v45 = vld [vmem:[%s7334_s23 + $0x20] sm:$0xff] }
 0xa84   :  { %2721 = vmatpush1.bf16.msra.mxu1 %v5630_v46  ;;  %v3073_v46 = vld [vmem:[%s7334_s23 + $0x28] sm:$0xff] }
 0xa85   :  { %2722 = vmatprep.subr.bf16.mxu1 %v5638_v15  ;;  %v3079_v15 = vld [vmem:[%s7334_s23 + $0x58] sm:$0xff] }
 0xa88   :  { %2723 = vmatpush1.bf16.msra.mxu1 %v5636_v18  ;;  %v3080_v18 = vld [vmem:[%s7334_s23 + $0x60] sm:$0xff] }
 0xa89   :  { %2724 = vmatprep.subr.bf16.mxu1 %v5644_v21 }
 0xa8c   :  { %2725 = vmatpush1.bf16.msra.mxu1 %v5642_v24  ;;  %v3083_v24 = vld [vmem:[%s7334_s23 + $0x78] sm:$0xff] }
 0xa8d   :  { %2726 = vmatprep.subr.bf16.mxu1 %v5650_v26 }
 0xa90   :  { %2727 = vmatpush1.bf16.msra.mxu1 %v5648_v27 }
 0xa91   :  { %5348 = vmatprep.subr.bf16.mxu1 %v6019_v23 }
 0xb44   :  { %v2226_v47 = vpop.f32.mrb[18].mxu0 }
 0xb45   :  { %v2301_v48 = vmul.f32 0.0078125, %v2226_v47  ;;  %v4960_v49 = vpop.f32.mrb[19].mxu0  ;;  %v5355_v47 = vpack.c.bf16 %v3073_v46, %v3072_v45 }
 0xb46   :  { %v2296_v50 = vpop.f32.mrb[18].mxu1 }
 0xb47   :  { %v2303_v51 = vmul.f32 %v2301_v48, %v2301_v48  ;;  %v2302_v52 = vmul.f32 0.0078125, %v2296_v50  ;;  %v4995_v53 = vpop.f32.mrb[19].mxu1 }
 0xb49   :  { %v2304_v54 = vsub.f32 %v2302_v52, %v2303_v51 }
 0xb4b   :  { %v2305_v56 = vmax.f32 %v2304_v54, 0.0 }
 0xb4d   :  { %v2306_v57 = vadd.f32 1e-05, %v2305_v56 }
 0xb4f   :  { %5727 = vrsqrt.f32 %v2306_v57 }
 0xb59   :  { %v5728_v59 = vpop.eup %5727 }
 0xb5a   :  { %v2309_v60 = vmul.f32 %v5728_v59, %v2308_v58 }
 0xb5c   :  { %5001 = vmatmul.mubr.msk.f32.vlgmr.msra.gmra.mrb[24].mxu0 %vm2315_vm7, %v2309_v60  ;;  %v2311_v63 = vmul.f32 %v2309_v60, %v2301_v48 }
 0xb5d   :  { %5347 = vmatpush3.bf16.msra.mxu0 %v5343_v36  ;;  %5007 = vmatprep.mubr.msk.f32.mxu0 %vm6018_vm0, %v6017_v19 }
 0xb5e   :  { %v2312_v2 = vsub.f32 %v2310_v62, %v2311_v63  ;;  %2669 = vmatprep.subr.bf16.mxu0 %v5605_v61  ;;  %v5652_v61 = vld [vmem:[%s7331_s20 + $0x18] sm:$0xff]   ;;  %v5653_v62 = vld [vmem:[%s7331_s20] sm:$0xff]   ;;  %v5654_v63 = vld [vmem:[%s7331_s20 + $0x8] sm:$0xff]  }
 0xb60   :  { %5008 = vmatmul.mubr.msk.f32.vlgmr.msra.gmra.mrb[26].mxu0 %vm2315_vm7, %v2312_v2  ;;  %v5656_v2 = vld [vmem:[%s7331_s20 + $0x28] sm:$0xff]  }
 0xb61   :  { %2670 = vmatpush1.bf16.msra.mxu0 %v5603_v1  ;;  %2701 = vmatprep.mubr.bf16.mxu0 %v6016_v0  ;;  %v5655_v1 = vld [vmem:[%s7331_s20 + $0x20] sm:$0xff]  }
 0xb62   :  { %2671 = vmatprep.subr.bf16.mxu0 %v5611_v3  ;;  %v5657_v3 = vld [vmem:[%s7331_s20 + $0x30] sm:$0xff]  }
 0xb65   :  { %2672 = vmatpush1.bf16.msra.mxu0 %v5609_v4  ;;  %v5658_v4 = vld [vmem:[%s7331_s20 + $0x38] sm:$0xff]  }
 0xb66   :  { %2673 = vmatprep.subr.bf16.mxu0 %v5617_v5  ;;  %v3074_v5 = vld [vmem:[%s7334_s23 + $0x30] sm:$0xff] }
 0xb69   :  { %2674 = vmatpush1.bf16.msra.mxu0 %v5615_v6  ;;  %v3075_v6 = vld [vmem:[%s7334_s23 + $0x38] sm:$0xff] }
 0xb6a   :  { %2675 = vmatprep.subr.bf16.mxu0 %v5623_v8  ;;  %v5358_v8 = vpack.c.bf16 %v3075_v6, %v3074_v5  ;;  %v3232_v6 = vld [vmem:[#allocation16] sm:$0x1] }
 0xb6d   :  { %2676 = vmatpush1.bf16.msra.mxu0 %v5621_v9  ;;  %v3076_v9 = vld [vmem:[%s7334_s23 + $0x40] sm:$0xff] }
 0xb6e   :  { %2677 = vmatprep.subr.bf16.mxu0 %v5629_v10  ;;  %v3077_v10 = vld [vmem:[%s7334_s23 + $0x48] sm:$0xff] }
 0xb71   :  { %2678 = vmatpush1.bf16.msra.mxu0 %v5627_v11  ;;  %v5361_v11 = vpack.c.bf16 %v3077_v10, %v3076_v9  ;;  %v5661_v10 = vld [vmem:[%s7380_s1 + $0x4] ss:$16 sps:$4 sm:$0xff]  }
 0xb72   :  { %2679 = vmatprep.subr.bf16.mxu0 %v5635_v12  ;;  %v3078_v12 = vld [vmem:[%s7334_s23 + $0x50] sm:$0xff] }
 0xb75   :  { %2680 = vmatpush1.bf16.msra.mxu0 %v5633_v17  ;;  %v5364_v17 = vpack.c.bf16 %v3079_v15, %v3078_v12  ;;  %v5659_v15 = vld [vmem:[%s7380_s1] ss:$16 sps:$4 sm:$0xff]  }
 0xb76   :  { %2681 = vmatprep.subr.bf16.mxu0 %v5641_v20  ;;  %v3081_v20 = vld [vmem:[%s7334_s23 + $0x68] sm:$0xff] }
 0xb77   :  { %v5367_v21 = vpack.c.bf16 %v3081_v20, %v3080_v18  ;;  %v5667_v18 = vld [vmem:[%s7380_s1 + $0x24] ss:$16 sps:$4 sm:$0xff]   ;;  %v5665_v20 = vld [vmem:[%s7380_s1 + $0x20] ss:$16 sps:$4 sm:$0xff]  }
 0xb79   :  { %2682 = vmatpush1.bf16.msra.mxu0 %v5639_v22  ;;  %v3082_v22 = vld [vmem:[%s7334_s23 + $0x70] sm:$0xff] }
 0xb7a   :  { %2683 = vmatprep.subr.bf16.mxu0 %v5647_v25  ;;  %v5370_v25 = vpack.c.bf16 %v3083_v24, %v3082_v22  ;;  %v5679_v22 = vld [vmem:[%s7380_s1 + $0x64] ss:$16 sps:$4 sm:$0xff]   ;;  %v5677_v24 = vld [vmem:[%s7380_s1 + $0x60] ss:$16 sps:$4 sm:$0xff]  }
 0xb7d   :  { %2684 = vmatpush1.bf16.msra.mxu0 %v5645_v55 }
 0xc2f   :  { %v2385_v28 = vpop.f32.mrb[24].mxu0 }
 0xc30   :  { %v2465_v29 = vrot.slane %v2385_v28, %v6528_v13  ;;  %v5002_v30 = vpop.f32.mrb[25].mxu0 }
 0xc32   :  { %v2466_v31 = vmul.f32 %v2465_v29, %v6861_v14  ;;  %v2467_v7 = vmul.f32 %v2465_v29, %v6863_v16  ;;  %v5651_v14 = vld [vmem:[%s7331_s20 + $0x10] sm:$0xff]   ;;  %v3068_v16 = vld [vmem:[%s7334_s23] sm:$0xff] }
 0xc33   :  { %v2458_v32 = vpop.f32.mrb[26].mxu0  ;;  %v5349_v41 = vpack.c.bf16 %v3069_v40, %v3068_v16 }
 0xc34   :  { %v2471_v33 = vrot.slane %v2458_v32, %v6528_v13  ;;  %v5009_v34 = vpop.f32.mrb[27].mxu0 }
 0xc36   :  { %v2472_v35 = vadd.f32 %v2471_v33, %v2466_v31  ;;  %v2473_v36 = vadd.f32 %v2471_v33, %v2467_v7 }
 0xc38   :  { %v2474_v37 = vmax.f32 %v2472_v35, 0.0  ;;  %v2475_v38 = vmax.f32 %v2473_v36, 0.0 }
 0xc3a   :  { %v2476_v39 = vpack.c.bf16 %v2475_v38, %v2474_v37 }
 0xc3c   :  { %2702 = vmatmul.mubr.bf16.vlgmr.msra.gmra.mrb[28].mxu0 %v2476_v39  ;;  %2745 = vmatmul.mubr.bf16.vlgmr.msra.gmra.mrb[28].mxu1 %v2476_v39 }
 0xc3d   :  { %5066 = vmatprep.mubr.msk.f32.mxu1 %vm6018_vm0, %v6017_v19  ;;  %5012 = vmatprep.mubr.msk.bf16.mxu0 %vm2315_vm7, %v5651_v14 }
 0xc3e   :  { %5350 = vmatpush3.bf16.msra.mxu1 %v5349_v41 }
 0xc3f   :  { %5351 = vmatprep.subr.bf16.mxu1 %v6019_v23 }
 0xc42   :  { %5353 = vmatpush3.bf16.msra.mxu1 %v5352_v44 }
 0xc43   :  { %5354 = vmatprep.subr.bf16.mxu1 %v6019_v23 }
 0xc46   :  { %5356 = vmatpush3.bf16.msra.mxu1 %v5355_v47 }
 0xc47   :  { %5357 = vmatprep.subr.bf16.mxu1 %v6019_v23 }
 0xc4a   :  { %5359 = vmatpush3.bf16.msra.mxu1 %v5358_v8 }
 0xc4b   :  { %5360 = vmatprep.subr.bf16.mxu1 %v6019_v23 }
 0xc4e   :  { %5362 = vmatpush3.bf16.msra.mxu1 %v5361_v11 }
 0xc4f   :  { %5363 = vmatprep.subr.bf16.mxu1 %v6019_v23 }
 0xc52   :  { %5365 = vmatpush3.bf16.msra.mxu1 %v5364_v17 }
 0xc53   :  { %5366 = vmatprep.subr.bf16.mxu1 %v6019_v23 }
 0xc56   :  { %5368 = vmatpush3.bf16.msra.mxu1 %v5367_v21 }
 0xc57   :  { %5369 = vmatprep.subr.bf16.mxu1 %v6019_v23 }
 0xc5a   :  { %5371 = vmatpush3.bf16.msra.mxu1 %v5370_v25 }
 0xc5b   :  { %5104 = vmatprep.subr.mxu1 %v6017_v19 }
 0xd0f   :  { %v2703_v48 = vpop.f32.mrb[28].mxu0  ;;  %v2746_v49 = vpop.f32.mrb[28].mxu1 }
 0xd10   :  { %v2705_v50 = vpop.f32.mrb[29].mxu0  ;;  %v2748_v51 = vpop.f32.mrb[29].mxu1 }
 0xd11   :  { %v2707_v52 = vpop.f32.mrb[30].mxu0  ;;  %v2750_v53 = vpop.f32.mrb[30].mxu1 }
 0xd12   :  { %v2755_v54 = vpack.c.bf16 %v2707_v52, %v2703_v48  ;;  %v2757_v56 = vpack.c.bf16 %v2750_v53, %v2746_v49  ;;  %v2709_v57 = vpop.f32.mrb[31].mxu0  ;;  %v2752_v58 = vpop.f32.mrb[31].mxu1  ;;  %v5662_v48 = vld [vmem:[%s7380_s1 + $0x8] ss:$16 sps:$4 sm:$0xff]   ;;  %v5664_v49 = vld [vmem:[%s7380_s1 + $0xc] ss:$16 sps:$4 sm:$0xff]  }
 0xd13   :  { %v2756_v59 = vpack.c.bf16 %v2709_v57, %v2705_v50  ;;  %v2758_v60 = vpack.c.bf16 %v2752_v58, %v2748_v51  ;;  %v5670_v50 = vld [vmem:[%s7380_s1 + $0x2c] ss:$16 sps:$4 sm:$0xff]   ;;  %v5668_v51 = vld [vmem:[%s7380_s1 + $0x28] ss:$16 sps:$4 sm:$0xff]  }
 0xd14   :  { %v5676_v52 = vld [vmem:[%s7380_s1 + $0x4c] ss:$16 sps:$4 sm:$0xff]   ;;  %v5674_v53 = vld [vmem:[%s7380_s1 + $0x48] ss:$16 sps:$4 sm:$0xff]  }
 0xd15   :  { %5010 = vmatprep.subr.bf16.mxu0 %v2756_v59  ;;  %v5688_v57 = vld [vmem:[%s7380_s1 + $0x8c] ss:$16 sps:$4 sm:$0xff]   ;;  %v5686_v58 = vld [vmem:[%s7380_s1 + $0x88] ss:$16 sps:$4 sm:$0xff]  }
 0xd16   :  { %5011 = vmatpush3.bf16.msra.mxu0 %v2756_v59 }
 0xd17   :  { %5016 = vmatprep.subr.bf16.mxu0 %v2755_v54 }
 0xd19   :  { %5013 = vmatmul.mubr.msk.bf16.vlgmr.msra.gmra.mrb[32].mxu0 %vm2315_vm7, %v5652_v61 }
 0xd1a   :  { %5017 = vmatpush3.bf16.msra.mxu0 %v2755_v54  ;;  %5018 = vmatprep.mubr.msk.bf16.mxu0 %vm2315_vm7, %v5653_v62  ;;  %v5682_v54 = vld [vmem:[%s7380_s1 + $0x6c] ss:$16 sps:$4 sm:$0xff]  }
 0xd1b   :  { %5022 = vmatprep.subr.bf16.mxu0 %v2757_v56 }
 0xd25   :  { %5019 = vmatmul.mubr.msk.bf16.vlgmr.msra.gmra.mrb[32].mxu0 %vm2315_vm7, %v5654_v63 }
 0xd26   :  { %5023 = vmatpush3.bf16.msra.mxu0 %v2757_v56  ;;  %5024 = vmatprep.mubr.msk.bf16.mxu0 %vm2315_vm7, %v5655_v1  ;;  %v5680_v56 = vld [vmem:[%s7380_s1 + $0x68] ss:$16 sps:$4 sm:$0xff]  }
 0xd27   :  { %5028 = vmatprep.subr.bf16.mxu0 %v2758_v60 }
 0xd31   :  { %5025 = vmatmul.mubr.msk.bf16.vlgmr.msra.gmra.mrb[32].mxu0 %vm2315_vm7, %v5656_v2 }
 0xd32   :  { %5029 = vmatpush3.bf16.msra.mxu0 %v2758_v60  ;;  %5030 = vmatprep.mubr.msk.bf16.mxu0 %vm2315_vm7, %v5657_v3 }
 0xd33   :  { %5372 = vmatprep.subr.bf16.mxu0 %v6019_v23 }
 0xd3d   :  { %5031 = vmatmul.mubr.msk.bf16.vlgmr.msra.gmra.mrb[32].mxu0 %vm2315_vm7, %v5658_v4 }
 0xd3e   :  { %5374 = vmatpush3.bf16.msra.mxu0 %v5349_v41  ;;  %5101 = vmatprep.mubr.msk.f32.mxu0 %vm6018_vm0, %v6017_v19 }
 0xd3f   :  { %5375 = vmatprep.subr.bf16.mxu0 %v6019_v23 }
 0xd42   :  { %5377 = vmatpush3.bf16.msra.mxu0 %v5352_v44 }
 0xd43   :  { %5378 = vmatprep.subr.bf16.mxu0 %v6019_v23 }
 0xd46   :  { %5380 = vmatpush3.bf16.msra.mxu0 %v5355_v47  ;;  %v3237_v47 = vld [vmem:[%s7335_s24] sm:$0xff] }
 0xd47   :  { %5381 = vmatprep.subr.bf16.mxu0 %v6019_v23 }
 0xd4a   :  { %5383 = vmatpush3.bf16.msra.mxu0 %v5358_v8 }
 0xd4b   :  { %5384 = vmatprep.subr.bf16.mxu0 %v6019_v23 }
 0xd4e   :  { %5386 = vmatpush3.bf16.msra.mxu0 %v5361_v11  ;;  %v3234_v11 = vld [vmem:[#allocation18] sm:$0x1] }
 0xd4f   :  { %5387 = vmatprep.subr.bf16.mxu0 %v6019_v23 }
 0xd52   :  { %5389 = vmatpush3.bf16.msra.mxu0 %v5364_v17 }
 0xd53   :  { %5390 = vmatprep.subr.bf16.mxu0 %v6019_v23 }
 0xd56   :  { %5392 = vmatpush3.bf16.msra.mxu0 %v5367_v21  ;;  %v5671_v21 = vld [vmem:[%s7380_s1 + $0x40] ss:$16 sps:$4 sm:$0xff]  }
 0xd57   :  { %5393 = vmatprep.subr.bf16.mxu0 %v6019_v23 }
 0xd5a   :  { %5395 = vmatpush3.bf16.msra.mxu0 %v5370_v25  ;;  %v5685_v25 = vld [vmem:[%s7380_s1 + $0x84] ss:$16 sps:$4 sm:$0xff]  }
 0xd5b   :  { %3651 = vmatprep.subr.bf16.mxu0 %v5664_v49 }
 0xe10   :  { %v7087_v26 = vpop.f32.mrb[32].mxu0 }
 0xe11   :  { %v7089_v55 = vpop.f32.mrb[33].mxu0  ;;  %v3057_v31 = vmul.f32 %v7087_v26, %v7087_v26 }
 0xe12   :  { %v7091_v27 = vpop.f32.mrb[34].mxu0  ;;  %v3055_v29 = vmul.f32 %v7089_v55, %v7089_v55 }
 0xe13   :  { %v7093_v28 = vpop.f32.mrb[35].mxu0  ;;  %v3058_v33 = vmul.f32 %v7091_v27, %v7091_v27 }
 0xe14   :  { %v3046_v30 = vadd.f32 %v7093_v28, %v7089_v55  ;;  %v3056_v23 = vmul.f32 %v7093_v28, %v7093_v28 }
 0xe16   :  { %v3047_v7 = vadd.f32 %v7087_v26, %v3046_v30  ;;  %v3059_v32 = vadd.f32 %v3056_v23, %v3055_v29  ;;  %v5683_v29 = vld [vmem:[%s7380_s1 + $0x80] ss:$16 sps:$4 sm:$0xff]   ;;  %v5691_v30 = vld [vmem:[%s7380_s1 + $0xa4] ss:$16 sps:$4 sm:$0xff]   ;;  %v5694_v23 = vld [vmem:[%s7380_s1 + $0xac] ss:$16 sps:$4 sm:$0xff]  }
 0xe18   :  { %v3048_v34 = vadd.f32 %v7091_v27, %v3047_v7  ;;  %v3060_v35 = vadd.f32 %v3059_v32, %v3057_v31  ;;  %v5689_v31 = vld [vmem:[%s7380_s1 + $0xa0] ss:$16 sps:$4 sm:$0xff]   ;;  %v5692_v7 = vld [vmem:[%s7380_s1 + $0xa8] ss:$16 sps:$4 sm:$0xff]   ;;  %v5697_v32 = vld [vmem:[%s7380_s1 + $0xc4] ss:$16 sps:$4 sm:$0xff]  }
 0xe1a   :  { %v3049_v36 = vrot.slane %v3048_v34, 4  ;;  %v3061_v37 = vadd.f32 %v3060_v35, %v3058_v33  ;;  %v5700_v33 = vld [vmem:[%s7380_s1 + $0xcc] ss:$16 sps:$4 sm:$0xff]   ;;  %v5698_v35 = vld [vmem:[%s7380_s1 + $0xc8] ss:$16 sps:$4 sm:$0xff]  }
 0xe1c   :  { %v3050_v38 = vadd.f32 %v3049_v36, %v3048_v34  ;;  %v3062_v39 = vrot.slane %v3061_v37, 4  ;;  %v5695_v34 = vld [vmem:[%s7380_s1 + $0xc0] ss:$16 sps:$4 sm:$0xff]   ;;  %v5703_v36 = vld [vmem:[%s7380_s1 + $0xe4] ss:$16 sps:$4 sm:$0xff]  }
 0xe1e   :  { %v3051_v14 = vrot.slane %v3050_v38, 2  ;;  %v3063_v16 = vadd.f32 %v3062_v39, %v3061_v37  ;;  %v5706_v37 = vld [vmem:[%s7380_s1 + $0xec] ss:$16 sps:$4 sm:$0xff]   ;;  %v5704_v39 = vld [vmem:[%s7380_s1 + $0xe8] ss:$16 sps:$4 sm:$0xff]  }
 0xe20   :  { %v3052_v40 = vadd.f32 %v3051_v14, %v3050_v38  ;;  %v3064_v41 = vrot.slane %v3063_v16, 2  ;;  %v5701_v38 = vld [vmem:[%s7380_s1 + $0xe0] ss:$16 sps:$4 sm:$0xff]  }
 0xe22   :  { %v3053_v42 = vrot.slane %v3052_v40, 1  ;;  %v3065_v43 = vadd.f32 %v3064_v41, %v3063_v16 }
 0xe24   :  { %v3054_v44 = vadd.f32 %v3053_v42, %v3052_v40  ;;  %v3066_v45 = vrot.slane %v3065_v43, 1 }
 0xe26   :  { %5067 = vmatmul.mubr.f32.vlgmr.msra.gmra.mrb[32].mxu1 %v3054_v44  ;;  %v3067_v46 = vadd.f32 %v3066_v45, %v3065_v43 }
 0xe27   :  { %5106 = vmatprep.mubr.msk.f32.mxu1 %vm6018_vm0, %v6017_v19  ;;  %5105 = vmatpush3.msra.mxu1 %v3237_v47 }
 0xe28   :  { %5102 = vmatmul.mubr.f32.vlgmr.msra.gmra.mrb[36].mxu0 %v3067_v46  ;;  %5109 = vmatprep.subr.mxu1 %v6017_v19 }
 0xe29   :  { %3683 = vmatprep.mubr.bf16.mxu0 %v6016_v0  ;;  %3652 = vmatpush1.bf16.msra.mxu0 %v5662_v48 }
 0xe2a   :  { %3653 = vmatprep.subr.bf16.mxu0 %v5670_v50 }
 0xe2d   :  { %3654 = vmatpush1.bf16.msra.mxu0 %v5668_v51 }
 0xe2e   :  { %3655 = vmatprep.subr.bf16.mxu0 %v5676_v52 }
 0xe31   :  { %3656 = vmatpush1.bf16.msra.mxu0 %v5674_v53 }
 0xe32   :  { %3657 = vmatprep.subr.bf16.mxu0 %v5682_v54 }
 0xe35   :  { %3658 = vmatpush1.bf16.msra.mxu0 %v5680_v56 }
 0xe36   :  { %3659 = vmatprep.subr.bf16.mxu0 %v5688_v57 }
 0xe39   :  { %3660 = vmatpush1.bf16.msra.mxu0 %v5686_v58 }
 0xe3a   :  { %3661 = vmatprep.subr.bf16.mxu0 %v5694_v23  ;;  %v5716_v23 = vld [vmem:[%s7381_s15 + $0x48] sm:$0xff]  }
 0xe3d   :  { %3662 = vmatpush1.bf16.msra.mxu0 %v5692_v7  ;;  %v5718_v7 = vld [vmem:[%s7381_s15 + $0x58] sm:$0xff]  }
 0xe3e   :  { %3663 = vmatprep.subr.bf16.mxu0 %v5700_v33  ;;  %v5720_v33 = vld [vmem:[%s7381_s15 + $0x68] sm:$0xff]  }
 0xe41   :  { %3664 = vmatpush1.bf16.msra.mxu0 %v5698_v35  ;;  %v5722_v35 = vld [vmem:[%s7381_s15 + $0x78] sm:$0xff]  }
 0xe42   :  { %3665 = vmatprep.subr.bf16.mxu0 %v5706_v37 }
 0xe45   :  { %3666 = vmatpush1.bf16.msra.mxu0 %v5704_v39 }
 0xef9   :  { %v3150_v59 = vpop.f32.mrb[32].mxu1 }
 0xefa   :  { %v3225_v60 = vmul.f32 0.001953125, %v3150_v59  ;;  %v5068_v61 = vpop.f32.mrb[33].mxu1 }
 0xefb   :  { %v3220_v62 = vpop.f32.mrb[36].mxu0 }
 0xefc   :  { %v3227_v63 = vmul.f32 %v3225_v60, %v3225_v60  ;;  %v3226_v1 = vmul.f32 0.001953125, %v3220_v62  ;;  %v5103_v2 = vpop.f32.mrb[37].mxu0 }
 0xefe   :  { %v3228_v3 = vsub.f32 %v3226_v1, %v3227_v63 }
 0xf00   :  { %v3229_v4 = vmax.f32 %v3228_v3, 0.0 }
 0xf02   :  { %v3230_v5 = vadd.f32 1e-05, %v3229_v4 }
 0xf04   :  { %5729 = vrsqrt.f32 %v3230_v5 }
 0xf0e   :  { %v5730_v8 = vpop.eup %5729 }
 0xf0f   :  { %v3233_v9 = vmul.f32 %v5730_v8, %v3232_v6 }
 0xf11   :  { %5107 = vmatmul.mubr.msk.f32.vlgmr.msra.gmra.mrb[34].mxu1 %vm364_vm2, %v3233_v9  ;;  %v3235_v12 = vmul.f32 %v3233_v9, %v3225_v60 }
 0xf12   :  { %5110 = vmatpush3.msra.mxu1 %v3237_v47  ;;  %5111 = vmatprep.mubr.msk.f32.mxu1 %vm6018_vm0, %v6017_v19  ;;  %v5673_v19 = vld [vmem:[%s7380_s1 + $0x44] ss:$16 sps:$4 sm:$0xff]  }
 0xf13   :  { %v3236_v17 = vsub.f32 %v3234_v11, %v3235_v12  ;;  %3598 = vmatprep.subr.bf16.mxu1 %v5661_v10 }
 0xf15   :  { %5112 = vmatmul.mubr.msk.f32.vlgmr.msra.gmra.mrb[36].mxu1 %vm364_vm2, %v3236_v17 }
 0xf16   :  { %3599 = vmatpush1.bf16.msra.mxu1 %v5659_v15  ;;  %3630 = vmatprep.mubr.bf16.mxu1 %v6016_v0 }
 0xf17   :  { %3600 = vmatprep.subr.bf16.mxu1 %v5667_v18 }
 0xf1a   :  { %3601 = vmatpush1.bf16.msra.mxu1 %v5665_v20  ;;  %v5708_v20 = vld [vmem:[%s7381_s15 + $0x28] sm:$0xff]  }
 0xf1b   :  { %3602 = vmatprep.subr.bf16.mxu1 %v5673_v19  ;;  %v5709_v19 = vld [vmem:[%s7381_s15 + $0x30] sm:$0xff]  }
 0xf1e   :  { %3603 = vmatpush1.bf16.msra.mxu1 %v5671_v21  ;;  %v5710_v21 = vld [vmem:[%s7381_s15 + $0x38] sm:$0xff]  }
 0xf1f   :  { %3604 = vmatprep.subr.bf16.mxu1 %v5679_v22  ;;  %v5711_v22 = vld [vmem:[%s7381_s15] sm:$0xff]  }
 0xf22   :  { %3605 = vmatpush1.bf16.msra.mxu1 %v5677_v24  ;;  %v5712_v24 = vld [vmem:[%s7381_s15 + $0x8] sm:$0xff]  }
 0xf23   :  { %3606 = vmatprep.subr.bf16.mxu1 %v5685_v25  ;;  %v5713_v25 = vld [vmem:[%s7381_s15 + $0x10] sm:$0xff]  }
 0xf26   :  { %3607 = vmatpush1.bf16.msra.mxu1 %v5683_v29  ;;  %v5714_v29 = vld [vmem:[%s7381_s15 + $0x18] sm:$0xff]  }
 0xf27   :  { %3608 = vmatprep.subr.bf16.mxu1 %v5691_v30  ;;  %v5715_v30 = vld [vmem:[%s7381_s15 + $0x40] sm:$0xff]  }
 0xf2a   :  { %3609 = vmatpush1.bf16.msra.mxu1 %v5689_v31  ;;  %v5717_v31 = vld [vmem:[%s7381_s15 + $0x50] sm:$0xff]  }
 0xf2b   :  { %3610 = vmatprep.subr.bf16.mxu1 %v5697_v32  ;;  %v5719_v32 = vld [vmem:[%s7381_s15 + $0x60] sm:$0xff]  }
 0xf2e   :  { %3611 = vmatpush1.bf16.msra.mxu1 %v5695_v34  ;;  %v5721_v34 = vld [vmem:[%s7381_s15 + $0x70] sm:$0xff]  }
 0xf2f   :  { %3612 = vmatprep.subr.bf16.mxu1 %v5703_v36 }
 0xf32   :  { %3613 = vmatpush1.bf16.msra.mxu1 %v5701_v38 }
 0xfe4   :  { %v3307_v14 = vpop.f32.mrb[34].mxu1 }
 0xfe5   :  { %v3387_v16 = vrot.slane %v3307_v14, %v6528_v13  ;;  %v5108_v40 = vpop.f32.mrb[35].mxu1 }
 0xfe7   :  { %v3388_v41 = vmul.f32 %v3387_v16, %v7089_v55  ;;  %v3389_v42 = vmul.f32 %v3387_v16, %v7093_v28  ;;  %v3390_v43 = vmul.f32 %v7087_v26, %v3387_v16  ;;  %v3391_v44 = vmul.f32 %v7091_v27, %v3387_v16 }
 0xfe8   :  { %v3380_v45 = vpop.f32.mrb[36].mxu1 }
 0xfe9   :  { %v3395_v46 = vrot.slane %v3380_v45, %v6528_v13  ;;  %v5113_v47 = vpop.f32.mrb[37].mxu1  ;;  %v5707_v13 = vld [vmem:[%s7381_s15 + $0x20] sm:$0xff]  }
 0xfeb   :  { %v3396_v48 = vadd.f32 %v3395_v46, %v3388_v41  ;;  %v3397_v49 = vadd.f32 %v3395_v46, %v3389_v42  ;;  %v3398_v50 = vadd.f32 %v3395_v46, %v3390_v43  ;;  %v3399_v51 = vadd.f32 %v3395_v46, %v3391_v44 }
 0xfed   :  { %v3400_v52 = vmax.f32 %v3396_v48, 0.0  ;;  %v3401_v53 = vmax.f32 %v3397_v49, 0.0  ;;  %v3402_v54 = vmax.f32 %v3398_v50, 0.0  ;;  %v3403_v56 = vmax.f32 %v3399_v51, 0.0 }
 0xfef   :  { %v3404_v57 = vpack.c.bf16 %v3401_v53, %v3400_v52  ;;  %v3405_v55 = vpack.c.bf16 %v3403_v56, %v3402_v54 }
 0xff1   :  { %3631 = vmatmul.mubr.bf16.vlgmr.msra.gmra.mrb[40].mxu1 %v3404_v57  ;;  %3684 = vmatmul.mubr.bf16.vlgmr.msra.gmra.mrb[40].mxu0 %v3404_v57 }
 0xff2   :  { %3640 = vmatprep.mubr.bf16.mxu1 %v6016_v0  ;;  %3693 = vmatprep.mubr.bf16.mxu0 %v6016_v0 }
 0xff9   :  { %3641 = vmatmul.mubr.bf16.gmra.mrb[44].mxu1 %v3405_v55  ;;  %3694 = vmatmul.mubr.bf16.gmra.mrb[44].mxu0 %v3405_v55 }
 0xffa   :  { %5118 = vmatprep.mubr.msk.bf16.mxu1 %vm1468_vm6, %v5707_v13 }
0x10c4   :  { %v3632_v26 = vpop.f32.mrb[40].mxu1  ;;  %v3685_v27 = vpop.f32.mrb[40].mxu0 }
0x10c5   :  { %v3634_v28 = vpop.f32.mrb[41].mxu1  ;;  %v3687_v58 = vpop.f32.mrb[41].mxu0 }
0x10c6   :  { %v3636_v59 = vpop.f32.mrb[42].mxu1  ;;  %v3689_v60 = vpop.f32.mrb[42].mxu0 }
0x10c7   :  { %v3704_v61 = vpack.c.bf16 %v3636_v59, %v3632_v26  ;;  %v3706_v62 = vpack.c.bf16 %v3689_v60, %v3685_v27  ;;  %v3638_v63 = vpop.f32.mrb[43].mxu1  ;;  %v3691_v1 = vpop.f32.mrb[43].mxu0 }
0x10c8   :  { %v3705_v2 = vpack.c.bf16 %v3638_v63, %v3634_v28  ;;  %v3707_v0 = vpack.c.bf16 %v3691_v1, %v3687_v58 }
0x10ca   :  { %5114 = vmatprep.subr.bf16.mxu1 %v3705_v2 }
0x10cb   :  { %5115 = vmatpush3.bf16.msra.mxu1 %v3705_v2 }
0x10cc   :  { %v3642_v3 = vpop.f32.mrb[44].mxu1  ;;  %v3695_v4 = vpop.f32.mrb[44].mxu0 }
0x10cd   :  { %v3644_v5 = vpop.f32.mrb[45].mxu1  ;;  %v3697_v6 = vpop.f32.mrb[45].mxu0 }
0x10ce   :  { %v3646_v8 = vpop.f32.mrb[46].mxu1  ;;  %v3699_v9 = vpop.f32.mrb[46].mxu0 }
0x10cf   :  { %v3708_v10 = vpack.c.bf16 %v3646_v8, %v3642_v3  ;;  %v3710_v11 = vpack.c.bf16 %v3699_v9, %v3695_v4  ;;  %v3648_v12 = vpop.f32.mrb[47].mxu1  ;;  %v3701_v15 = vpop.f32.mrb[47].mxu0 }
0x10d0   :  { %v3709_v17 = vpack.c.bf16 %v3648_v12, %v3644_v5  ;;  %v3711_v18 = vpack.c.bf16 %v3701_v15, %v3697_v6 }
0x10d2   :  { %5116 = vmatprep.subr.bf16.mxu1 %v3709_v17 }
0x10d3   :  { %5117 = vmatpush3.bf16.msra.mxu1 %v3709_v17 }
0x10d4   :  { %5126 = vmatprep.subr.bf16.mxu1 %v3704_v61 }
0x10d6   :  { %5119 = vmatmul.mubr.msk.bf16.vlgmr.msra.gmra.mrb[48].mxu1 %vm1468_vm6, %v5708_v20 }
0x10d7   :  { %5127 = vmatpush3.bf16.msra.mxu1 %v3704_v61  ;;  %5122 = vmatprep.mubr.msk.bf16.mxu1 %vm1468_vm6, %v5709_v19 }
0x10d8   :  { %5128 = vmatprep.subr.bf16.mxu1 %v3708_v10 }
0x10db   :  { %5129 = vmatpush3.bf16.msra.mxu1 %v3708_v10 }
0x10dc   :  { %5138 = vmatprep.subr.bf16.mxu1 %v3706_v62 }
0x10de   :  { %5123 = vmatmul.mubr.msk.bf16.gmra.mrb[52].mxu1 %vm1468_vm6, %v5710_v21 }
0x10df   :  { %5130 = vmatprep.mubr.msk.bf16.mxu1 %vm1468_vm6, %v5711_v22 }
0x10e6   :  { %5131 = vmatmul.mubr.msk.bf16.vlgmr.msra.gmra.mrb[48].mxu1 %vm1468_vm6, %v5712_v24 }
0x10e7   :  { %5139 = vmatpush3.bf16.msra.mxu1 %v3706_v62  ;;  %5134 = vmatprep.mubr.msk.bf16.mxu1 %vm1468_vm6, %v5713_v25 }
0x10e8   :  { %5140 = vmatprep.subr.bf16.mxu1 %v3710_v11 }
0x10eb   :  { %5141 = vmatpush3.bf16.msra.mxu1 %v3710_v11 }
0x10ec   :  { %5150 = vmatprep.subr.bf16.mxu1 %v3707_v0 }
0x10ee   :  { %5135 = vmatmul.mubr.msk.bf16.gmra.mrb[52].mxu1 %vm1468_vm6, %v5714_v29 }
0x10ef   :  { %5142 = vmatprep.mubr.msk.bf16.mxu1 %vm1468_vm6, %v5715_v30 }
0x10f6   :  { %5143 = vmatmul.mubr.msk.bf16.vlgmr.msra.gmra.mrb[48].mxu1 %vm1468_vm6, %v5716_v23 }
0x10f7   :  { %5151 = vmatpush3.bf16.msra.mxu1 %v3707_v0  ;;  %5146 = vmatprep.mubr.msk.bf16.mxu1 %vm1468_vm6, %v5717_v31 }
0x10f8   :  { %5152 = vmatprep.subr.bf16.mxu1 %v3711_v18 }
0x10fb   :  { %5153 = vmatpush3.bf16.msra.mxu1 %v3711_v18 }
0x10fe   :  { %5147 = vmatmul.mubr.msk.bf16.gmra.mrb[52].mxu1 %vm1468_vm6, %v5718_v7 }
0x10ff   :  { %5154 = vmatprep.mubr.msk.bf16.mxu1 %vm1468_vm6, %v5719_v32 }
0x1106   :  { %5155 = vmatmul.mubr.msk.bf16.vlgmr.msra.gmra.mrb[48].mxu1 %vm1468_vm6, %v5720_v33 }
0x1107   :  { %5158 = vmatprep.mubr.msk.bf16.mxu1 %vm1468_vm6, %v5721_v34 }
0x110e   :  { %5159 = vmatmul.mubr.msk.bf16.gmra.mrb[52].mxu1 %vm1468_vm6, %v5722_v35 }
0x11d9   :  { %v5156_v36 = vpop.f32.mrb[48].mxu1 }
0x11da   :  { %5731 = vtanh.f32 %v5156_v36  ;;  %v4112_v37 = vpop.f32.mrb[49].mxu1 }
0x11db   :  { %5733 = vtanh.f32 %v4112_v37  ;;  %v5157_v38 = vpop.f32.mrb[50].mxu1 }
0x11dc   :  { %5735 = vtanh.f32 %v5157_v38  ;;  %v4115_v39 = vpop.f32.mrb[51].mxu1 }
0x11dd   :  { %5737 = vtanh.f32 %v4115_v39 }
0x11e1   :  { %v5160_v14 = vpop.f32.mrb[52].mxu1 }
0x11e2   :  { %5739 = vtanh.f32 %v5160_v14  ;;  %v4128_v16 = vpop.f32.mrb[53].mxu1 }
0x11e3   :  { %5741 = vtanh.f32 %v4128_v16  ;;  %v5161_v40 = vpop.f32.mrb[54].mxu1 }
0x11e4   :  { %v5732_v41 = vpop.eup %5731  ;;  %5743 = vtanh.f32 %v5161_v40  ;;  %v4131_v42 = vpop.f32.mrb[55].mxu1 }
0x11e5   :  { %v5734_v43 = vpop.eup %5733  ;;  %4161 = vst [vmem:[%s7382_s19 + $0x10] sm:$0xff] %v5732_v41  ;;  %5745 = vtanh.f32 %v4131_v42 }
0x11e6   :  { %v5736_v44 = vpop.eup %5735  ;;  %4159 = vst [vmem:[%s7382_s19] sm:$0xff] %v5734_v43 }
0x11e7   :  { %v5738_v45 = vpop.eup %5737  ;;  %4162 = vst [vmem:[%s7382_s19 + $0x18] sm:$0xff] %v5736_v44 }
0x11e8   :  { %4160 = vst [vmem:[%s7382_s19 + $0x8] sm:$0xff] %v5738_v45 }
0x11ec   :  { %v5740_v46 = vpop.eup %5739 }
0x11ed   :  { %v5742_v47 = vpop.eup %5741  ;;  %4165 = vst [vmem:[%s7382_s19 + $0x30] sm:$0xff] %v5740_v46 }
0x11ee   :  { %v5744_v48 = vpop.eup %5743  ;;  %4163 = vst [vmem:[%s7382_s19 + $0x20] sm:$0xff] %v5742_v47 }
0x11ef   :  { %v5746_v49 = vpop.eup %5745  ;;  %4166 = vst [vmem:[%s7382_s19 + $0x38] sm:$0xff] %v5744_v48 }
0x11f0   :  { %4164 = vst [vmem:[%s7382_s19 + $0x28] sm:$0xff] %v5746_v49 }
0x11f1   :  { %4171 = vsyncpa [#allocation3], 1 }
0x11f2   :  { %4172 = vsyncpa [#allocation5], 1 }
0x11f3   :  { %4173 = vsyncpa [#allocation8], 1 }
0x11f4   :  { %4174 = vsyncpa [#allocation11], 1 }
0x11f5   :  { %4175 = vsyncpa [#allocation14], 1 }
0x11f6   :  { %4176 = vsyncpa [#allocation17], 1 }

</bundles_post_ra>
